<compile_context>
chip_gen: v7x
topology: tpu7x:2x2x1
jax: 0.10.0
libtpu: 0.0.40
codegen_flags: <defaults>
</compile_context>

<pallas_src>
import functools

import jax
import jax.numpy as jnp
from jax.experimental import pallas as pl
from jax.experimental.pallas import tpu as pltpu


# ---------------------------- VMEM budgeting ---------------------------------
# Tile planning targets ~36 MiB of live double-buffered blocks; every large
# pallas_call gets an explicit 48 MiB scoped-VMEM limit (above the 16/32 MiB
# defaults on v5e / v6e-v7x, below the 64 MiB physical ceiling of v7x).
_GEMM_PLAN_BUDGET = 36 * 1024 * 1024
_VMEM_LIMIT = 48 * 1024 * 1024

_TM_CANDIDATES = (1024, 768, 512, 384, 256, 128, 64, 32, 16, 8)


# ------------------------------ tile helpers --------------------------------

def _pick_tile(dim, targets=(1024, 768, 512, 384, 256, 128, 64, 32, 16, 8)):
    """Largest target tile that evenly divides `dim`; bounded divisor fallback."""
    for t in targets:
        if t <= dim and dim % t == 0:
            return t
    # never return a multi-thousand-row dimension as a single block
    for t in range(min(dim, 1024), 0, -1):
        if dim % t == 0:
            return t
    return dim


def _apply_act(y, act):
    if act == "gelu":
        # exact erf-based GELU (HF BERT default intermediate_act_fn)
        return 0.5 * y * (1.0 + jax.lax.erf(y * 0.7071067811865476))
    if act == "tanh":
        return jnp.tanh(y)
    return y


# ------------------------------ linear (GEMM) --------------------------------

def _linear_resident_kernel(x_ref, w_ref, b_ref, o_ref, *, act):
    # full-K x panel resident across the weight-streaming j axis; no k loop.
    y = jnp.dot(x_ref[...], w_ref[...], preferred_element_type=jnp.float32)
    y = y + b_ref[...].astype(jnp.float32)
    o_ref[...] = _apply_act(y, act).astype(o_ref.dtype)


def _linear_ktiled_kernel(x_ref, w_ref, b_ref, o_ref, acc_ref, *, act):
    k = pl.program_id(2)

    @pl.when(k == 0)
    def _():
        acc_ref[...] = jnp.zeros_like(acc_ref)

    acc_ref[...] += jnp.dot(x_ref[...], w_ref[...],
                            preferred_element_type=jnp.float32)

    @pl.when(k == pl.num_programs(2) - 1)
    def _():
        y = acc_ref[...] + b_ref[...].astype(jnp.float32)
        o_ref[...] = _apply_act(y, act).astype(o_ref.dtype)


def pallas_linear(x, w, b, act=None, out_dtype=jnp.bfloat16):
    """y = act(x @ w + b).  Prefers a resident full-K x panel (weights streamed
    over N) which removes the k reduction axis and raises arithmetic intensity
    to ~tm flops/byte; falls back to a K-tiled accumulator plan otherwise."""
    M, K = x.shape
    _, N = w.shape
    tn = _pick_tile(N, (768, 512, 384, 256, 128, 64, 32, 16, 8))

    # Plan A: resident (tm, K) x panel, 2-D grid (i, j), j (weights) innermost.
    tm_resident = None
    for tm in _TM_CANDIDATES:
        if tm <= M and M % tm == 0:
            # bf16 blocks, double-buffered: x panel + weight tile + output tile
            if 4 * (tm * K + K * tn + tm * tn) <= _GEMM_PLAN_BUDGET:
                tm_resident = tm
                break
    if tm_resident is not None:
        tm = tm_resident
        # TODO(synk): add pipeline_mode=pl.Buffered(3) on the weight spec if
        # profiling shows exposed weight DMA (v5e HBM) and VMEM allows.
        return pl.pallas_call(
            functools.partial(_linear_resident_kernel, act=act),
            grid=(M // tm, N // tn),
            in_specs=[pl.BlockSpec((tm, K), lambda i, j: (i, 0)),
                      pl.BlockSpec((K, tn), lambda i, j: (0, j)),
                      pl.BlockSpec((1, tn), lambda i, j: (0, j))],
            out_specs=pl.BlockSpec((tm, tn), lambda i, j: (i, j)),
            out_shape=jax.ShapeDtypeStruct((M, N), out_dtype),
            compiler_params=pltpu.CompilerParams(
                dimension_semantics=("parallel", "parallel"),
                vmem_limit_bytes=_VMEM_LIMIT),
        )(x, w, b)

    # Plan B: K-tiled reduction with f32 accumulator (very large K fallback).
    tm = _pick_tile(M, (512, 384, 256, 128, 64, 32, 16, 8))
    tk = _pick_tile(K, (512, 384, 256, 128, 64, 32, 16, 8))
    return pl.pallas_call(
        functools.partial(_linear_ktiled_kernel, act=act),
        grid=(M // tm, N // tn, K // tk),
        in_specs=[pl.BlockSpec((tm, tk), lambda i, j, k: (i, k)),
                  pl.BlockSpec((tk, tn), lambda i, j, k: (k, j)),
                  pl.BlockSpec((1, tn), lambda i, j, k: (0, j))],
        out_specs=pl.BlockSpec((tm, tn), lambda i, j, k: (i, j)),
        out_shape=jax.ShapeDtypeStruct((M, N), out_dtype),
        scratch_shapes=[pltpu.VMEM((tm, tn), jnp.float32)],
        compiler_params=pltpu.CompilerParams(
            dimension_semantics=("parallel", "parallel", "arbitrary"),
            vmem_limit_bytes=_VMEM_LIMIT),
    )(x, w, b)


# --------------- linear + bias + residual + LayerNorm (fused) ----------------

def _linear_res_ln_resident_kernel(x_ref, w_ref, b_ref, r_ref, g_ref, bb_ref,
                                   o_ref, *, eps):
    y = jnp.dot(x_ref[...], w_ref[...], preferred_element_type=jnp.float32)
    y = y + b_ref[...].astype(jnp.float32) + r_ref[...].astype(jnp.float32)
    mu = jnp.mean(y, axis=-1, keepdims=True)
    var = jnp.mean(jnp.square(y - mu), axis=-1, keepdims=True)
    inv = jax.lax.rsqrt(var + eps)
    o_ref[...] = ((y - mu) * inv * g_ref[...].astype(jnp.float32)
                  + bb_ref[...].astype(jnp.float32)).astype(o_ref.dtype)


def _linear_res_ln_ktiled_kernel(x_ref, w_ref, b_ref, r_ref, g_ref, bb_ref,
                                 o_ref, acc_ref, *, eps):
    k = pl.program_id(1)

    @pl.when(k == 0)
    def _():
        acc_ref[...] = jnp.zeros_like(acc_ref)

    acc_ref[...] += jnp.dot(x_ref[...], w_ref[...],
                            preferred_element_type=jnp.float32)

    @pl.when(k == pl.num_programs(1) - 1)
    def _():
        y = (acc_ref[...] + b_ref[...].astype(jnp.float32)
             + r_ref[...].astype(jnp.float32))
        mu = jnp.mean(y, axis=-1, keepdims=True)
        var = jnp.mean(jnp.square(y - mu), axis=-1, keepdims=True)
        inv = jax.lax.rsqrt(var + eps)
        o_ref[...] = ((y - mu) * inv * g_ref[...].astype(jnp.float32)
                      + bb_ref[...].astype(jnp.float32)).astype(o_ref.dtype)


def pallas_linear_res_ln(x, w, b, residual, gamma, beta,
                         out_dtype=jnp.bfloat16, eps=1e-12):
    """y = LayerNorm(x @ w + b + residual); N kept whole (LN needs full rows).
    Prefers a resident [K, N] weight panel (fetched once over the whole M grid,
    streaming only x/residual tiles)."""
    M, K = x.shape
    _, N = w.shape

    # Plan A: resident weight panel, 1-D grid over M, no k reduction.
    tm_resident = None
    for tm in _TM_CANDIDATES:
        if tm <= M and M % tm == 0:
            # bf16, double-buffered: x tile + weight panel + residual + output
            if 4 * (tm * K + K * N + 2 * tm * N) <= _GEMM_PLAN_BUDGET:
                tm_resident = tm
                break
    if tm_resident is not None:
        tm = tm_resident
        return pl.pallas_call(
            functools.partial(_linear_res_ln_resident_kernel, eps=eps),
            grid=(M // tm,),
            in_specs=[pl.BlockSpec((tm, K), lambda i: (i, 0)),
                      pl.BlockSpec((K, N), lambda i: (0, 0)),
                      pl.BlockSpec((1, N), lambda i: (0, 0)),
                      pl.BlockSpec((tm, N), lambda i: (i, 0)),
                      pl.BlockSpec((1, N), lambda i: (0, 0)),
                      pl.BlockSpec((1, N), lambda i: (0, 0))],
            out_specs=pl.BlockSpec((tm, N), lambda i: (i, 0)),
            out_shape=jax.ShapeDtypeStruct((M, N), out_dtype),
            compiler_params=pltpu.CompilerParams(
                dimension_semantics=("parallel",),
                vmem_limit_bytes=_VMEM_LIMIT),
        )(x, w, b, residual, gamma, beta)

    # Plan B: K-tiled reduction with accumulator.
    tm = _pick_tile(M, (512, 384, 256, 128, 64, 32, 16, 8))
    tk = _pick_tile(K, (512, 384, 256, 128, 64, 32, 16, 8))
    return pl.pallas_call(
        functools.partial(_linear_res_ln_ktiled_kernel, eps=eps),
        grid=(M // tm, K // tk),
        in_specs=[pl.BlockSpec((tm, tk), lambda i, k: (i, k)),
                  pl.BlockSpec((tk, N), lambda i, k: (k, 0)),
                  pl.BlockSpec((1, N), lambda i, k: (0, 0)),
                  pl.BlockSpec((tm, N), lambda i, k: (i, 0)),
                  pl.BlockSpec((1, N), lambda i, k: (0, 0)),
                  pl.BlockSpec((1, N), lambda i, k: (0, 0))],
        out_specs=pl.BlockSpec((tm, N), lambda i, k: (i, 0)),
        out_shape=jax.ShapeDtypeStruct((M, N), out_dtype),
        scratch_shapes=[pltpu.VMEM((tm, N), jnp.float32)],
        compiler_params=pltpu.CompilerParams(
            dimension_semantics=("parallel", "arbitrary"),
            vmem_limit_bytes=_VMEM_LIMIT),
    )(x, w, b, residual, gamma, beta)


# ------------------------------ layernorm (tiled) ----------------------------

def _layernorm_kernel(x_ref, g_ref, b_ref, o_ref, *, eps):
    x = x_ref[...].astype(jnp.float32)
    mu = jnp.mean(x, axis=-1, keepdims=True)
    var = jnp.mean(jnp.square(x - mu), axis=-1, keepdims=True)
    inv = jax.lax.rsqrt(var + eps)
    o_ref[...] = ((x - mu) * inv * g_ref[...].astype(jnp.float32)
                  + b_ref[...].astype(jnp.float32)).astype(o_ref.dtype)


def pallas_layernorm(x, g, b, out_dtype=jnp.bfloat16, eps=1e-12):
    M, N = x.shape
    tm = _pick_tile(M, (512, 256, 128, 64, 32, 16, 8))
    return pl.pallas_call(
        functools.partial(_layernorm_kernel, eps=eps),
        grid=(M // tm,),
        in_specs=[pl.BlockSpec((tm, N), lambda i: (i, 0)),
                  pl.BlockSpec((1, N), lambda i: (0, 0)),
                  pl.BlockSpec((1, N), lambda i: (0, 0))],
        out_specs=pl.BlockSpec((tm, N), lambda i: (i, 0)),
        out_shape=jax.ShapeDtypeStruct((M, N), out_dtype),
        compiler_params=pltpu.CompilerParams(
            dimension_semantics=("parallel",),
            vmem_limit_bytes=_VMEM_LIMIT),
    )(x, g, b)


# ------------------------------- attention -----------------------------------

def _attn_kernel(q_ref, k_ref, v_ref, m_ref, o_ref, *, hb, d, scale):
    """One (batch, head-block) step: hb heads of width d over the full sequence."""
    mask = m_ref[0].astype(jnp.float32)                 # [1, S] additive bias
    # TODO(synk): flash-style online softmax over a KV grid axis for S >= 1024
    # (the [S, S] f32 score transient is the first thing to blow the 64 MiB
    # VMEM budget on v7x at long sequence).
    for h in range(hb):                                 # hb is 2-4: tiny unroll
        q = q_ref[0, :, h * d:(h + 1) * d]
        k = k_ref[0, :, h * d:(h + 1) * d]
        v = v_ref[0, :, h * d:(h + 1) * d]
        # QK^T: contraction over both operands' last dim (same form the
        # reference flash kernels use).
        s = jax.lax.dot_general(q, k, (((1,), (1,)), ((), ())),
                                preferred_element_type=jnp.float32)
        s = s * scale + mask
        mx = jnp.max(s, axis=-1, keepdims=True)
        p = jnp.exp(s - mx)
        denom = jnp.sum(p, axis=-1, keepdims=True)
        p = p * pl.reciprocal(denom, approx=True)       # EUP, frees VALU slots
        ctx = jnp.dot(p.astype(v.dtype), v, preferred_element_type=jnp.float32)
        # incremental store: bounds live ranges, no concat relayout
        o_ref[0, :, h * d:(h + 1) * d] = ctx.astype(o_ref.dtype)


def pallas_attention(qkv, mask, heads, scale, out_dtype=jnp.bfloat16):
    """Multi-head self-attention over a fused [B, S, 3H] QKV slab.

    Grid is (batch, head-block); Q/K/V are three BlockSpec views of the SAME
    qkv array (128/256-lane slabs); context is written lane-dense per block.
    """
    B, S, H3 = qkv.shape
    H = H3 // 3
    d = H // heads
    # Head-block targets 256 lanes per step (matches the 256-wide MXU on
    # v6e/v7x; 128 lanes already saturate the v5e MXU width).
    hb = max(1, min(heads, 256 // max(d, 1)))
    while heads % hb:
        hb -= 1
    lw = hb * d

    if lw % 128 == 0:
        n_hb = H // lw                                   # head-blocks per batch
        return pl.pallas_call(
            functools.partial(_attn_kernel, hb=hb, d=d, scale=scale),
            grid=(B, n_hb),
            in_specs=[
                pl.BlockSpec((1, S, lw), lambda b, j: (b, 0, j)),
                pl.BlockSpec((1, S, lw), lambda b, j: (b, 0, n_hb + j)),
                pl.BlockSpec((1, S, lw), lambda b, j: (b, 0, 2 * n_hb + j)),
                pl.BlockSpec((1, 1, S), lambda b, j: (b, 0, 0)),
            ],
            out_specs=pl.BlockSpec((1, S, lw), lambda b, j: (b, 0, j)),
            out_shape=jax.ShapeDtypeStruct((B, S, H), out_dtype),
            compiler_params=pltpu.CompilerParams(
                dimension_semantics=("parallel", "parallel"),
                vmem_limit_bytes=_VMEM_LIMIT),
        )(qkv, qkv, qkv, mask)

    # Fallback for tiny / unaligned head widths: whole-H blocks on pre-split
    # q/k/v so every block dimension equals the full array dimension.
    q, k, v = qkv[..., :H], qkv[..., H:2 * H], qkv[..., 2 * H:]
    return pl.pallas_call(
        functools.partial(_attn_kernel, hb=heads, d=d, scale=scale),
        grid=(B,),
        in_specs=[pl.BlockSpec((1, S, H), lambda b: (b, 0, 0)),
                  pl.BlockSpec((1, S, H), lambda b: (b, 0, 0)),
                  pl.BlockSpec((1, S, H), lambda b: (b, 0, 0)),
                  pl.BlockSpec((1, 1, S), lambda b: (b, 0, 0))],
        out_specs=pl.BlockSpec((1, S, H), lambda b: (b, 0, 0)),
        out_shape=jax.ShapeDtypeStruct((B, S, H), out_dtype),
        compiler_params=pltpu.CompilerParams(
            dimension_semantics=("parallel",),
            vmem_limit_bytes=_VMEM_LIMIT),
    )(q, k, v, mask)


# ------------- fused classification head (pooler + classifier + CE) ----------

def _cls_head_kernel(cls_ref, pw_ref, pb_ref, cw_ref, cb_ref, oh_ref,
                     logits_ref, loss_ref):
    pooled = jnp.tanh(
        jnp.dot(cls_ref[...], pw_ref[...], preferred_element_type=jnp.float32)
        + pb_ref[...].astype(jnp.float32))
    logits = (jnp.dot(pooled.astype(cw_ref.dtype), cw_ref[...],
                      preferred_element_type=jnp.float32)
              + cb_ref[...].astype(jnp.float32))
    logits_ref[...] = logits
    m = jnp.max(logits, axis=-1, keepdims=True)
    lse = m + jnp.log(jnp.sum(jnp.exp(logits - m), axis=-1, keepdims=True))
    nll = oh_ref[...] * (lse - logits)
    loss_ref[...] = jnp.sum(nll, axis=(0, 1), keepdims=True) / logits.shape[0]


def pallas_cls_head(cls, pooler_w, pooler_b, cls_w, cls_b, onehot):
    B = cls.shape[0]
    num_labels = cls_w.shape[1]
    logits, loss = pl.pallas_call(
        _cls_head_kernel,
        out_shape=(jax.ShapeDtypeStruct((B, num_labels), jnp.float32),
                   jax.ShapeDtypeStruct((1, 1), jnp.float32)),
    )(cls, pooler_w, pooler_b, cls_w, cls_b, onehot)
    return logits, loss[0, 0]


# ------------------------------ parameters -----------------------------------

def init_params(key, vocab, max_pos, hidden, inter, layers, num_labels):
    def dense(k, din, dout):
        return {"w": (jax.random.normal(k, (din, dout), jnp.float32)
                      * 0.02).astype(jnp.bfloat16),
                "b": jnp.zeros((1, dout), jnp.float32)}

    keys = jax.random.split(key, 8 + layers)
    params = {
        "word_emb": jax.random.normal(keys[0], (vocab, hidden), jnp.float32) * 0.02,
        "pos_emb": jax.random.normal(keys[1], (max_pos, hidden), jnp.float32) * 0.02,
        "tok_emb": jax.random.normal(keys[2], (2, hidden), jnp.float32) * 0.02,
        "emb_ln_g": jnp.ones((1, hidden), jnp.float32),
        "emb_ln_b": jnp.zeros((1, hidden), jnp.float32),
        "pooler": dense(keys[3], hidden, hidden),
        "classifier": dense(keys[4], hidden, num_labels),
        "layers": [],
    }
    for li in range(layers):
        k = jax.random.split(keys[8 + li], 4)
        params["layers"].append({
            "qkv": dense(k[0], hidden, 3 * hidden),     # fused Q,K,V projection
            "ao": dense(k[1], hidden, hidden),
            "ln1_g": jnp.ones((1, hidden), jnp.float32),
            "ln1_b": jnp.zeros((1, hidden), jnp.float32),
            "inter": dense(k[2], hidden, inter),
            "out": dense(k[3], inter, hidden),
            "ln2_g": jnp.ones((1, hidden), jnp.float32),
            "ln2_b": jnp.zeros((1, hidden), jnp.float32),
        })
    return params


# ------------------------------- forward --------------------------------------

def bert_forward(params, input_ids, attention_mask, labels, *, heads):
    B, S = input_ids.shape
    H = params["word_emb"].shape[1]
    d = H // heads
    num_labels = params["classifier"]["w"].shape[1]

    # --- embeddings (dynamic table gathers are XLA glue; LayerNorm is Pallas) ---
    emb = (params["word_emb"][input_ids]
           + params["pos_emb"][:S][None, :, :]
           + params["tok_emb"][0][None, None, :])          # token_type_ids == 0
    x = pallas_layernorm(emb.reshape(B * S, H),
                         params["emb_ln_g"], params["emb_ln_b"])   # bf16 [B*S,H]
    # dropout layers are identity in eval mode.

    ext_mask = ((1.0 - attention_mask.astype(jnp.float32))
                * -10000.0)[:, None, :]                     # [B, 1, S]
    scale = 1.0 / (d ** 0.5)

    for lp in params["layers"]:
        # fused QKV projection: one GEMM, x panel resident, weights streamed
        qkv = pallas_linear(x, lp["qkv"]["w"], lp["qkv"]["b"])       # [B*S, 3H]
        # attention over a (batch, head-block) grid; lane-dense [B, S, H] ctx
        ctx = pallas_attention(qkv.reshape(B, S, 3 * H), ext_mask, heads, scale)
        ctx = ctx.reshape(B * S, H)
        # attn-out GEMM with fused bias + residual + LayerNorm epilogue
        x1 = pallas_linear_res_ln(ctx, lp["ao"]["w"], lp["ao"]["b"],
                                  x, lp["ln1_g"], lp["ln1_b"])
        # FFN: intermediate GEMM with exact-erf GELU epilogue
        inter = pallas_linear(x1, lp["inter"]["w"], lp["inter"]["b"], act="gelu")
        # FFN-out GEMM with fused bias + residual + LayerNorm epilogue
        x = pallas_linear_res_ln(inter, lp["out"]["w"], lp["out"]["b"],
                                 x1, lp["ln2_g"], lp["ln2_b"])

    cls = x.reshape(B, S, H)[:, 0, :]                       # [CLS] token, bf16
    onehot = jax.nn.one_hot(labels, num_labels, dtype=jnp.float32)
    # pooler(tanh) + classifier + mean cross-entropy fused into one pallas_call
    logits, loss = pallas_cls_head(cls, params["pooler"]["w"],
                                   params["pooler"]["b"],
                                   params["classifier"]["w"],
                                   params["classifier"]["b"], onehot)
    return loss, logits


# --------------------------------- main ----------------------------------------

if __name__ == "__main__":
    # small but lane-aligned shapes (head_dim=64 -> 128-lane head blocks)
    B, S = 2, 8
    H, heads, inter, layers = 128, 2, 512, 2
    vocab, max_pos, num_labels = 64, 16, 3

    key = jax.random.PRNGKey(0)
    kp, kid, klab = jax.random.split(key, 3)

    params = init_params(kp, vocab, max_pos, H, inter, layers, num_labels)
    input_ids = jax.random.randint(kid, (B, S), 0, vocab, dtype=jnp.int32)
    attention_mask = jnp.array([[1, 1, 1, 1, 1, 1, 1, 1],
                                [1, 1, 1, 1, 1, 1, 0, 0]], dtype=jnp.int32)
    labels = jax.random.randint(klab, (B,), 0, num_labels, dtype=jnp.int32)

    fwd = jax.jit(functools.partial(bert_forward, heads=heads))
    loss, logits = fwd(params, input_ids, attention_mask, labels)
    jax.block_until_ready((loss, logits))

    assert logits.shape == (B, num_labels)
    assert loss.shape == ()
    assert bool(jnp.isfinite(loss))
    print("KERNEL_OK")
</pallas_src>

<mosaic_0001>
module attributes {stable_mosaic.version = 11 : i64} {
  func.func @_layernorm_kernel(%arg0: i32, %arg1: memref<16x128xf32, #tpu.memory_space<vmem>>, %arg2: memref<1x128xf32, #tpu.memory_space<vmem>>, %arg3: memref<1x128xf32, #tpu.memory_space<vmem>>, %arg4: memref<16x128xbf16, #tpu.memory_space<vmem>>) attributes {dimension_semantics = [#tpu.dimension_semantics<parallel>], iteration_bounds = array<i64: 1>, scalar_prefetch = 0 : i64, scratch_operands = 0 : i64, tpu.core_type = #tpu.core_type<tc>, window_params = [{transform_indices = @transform_0, window_bounds = array<i64: 16, 128>}, {pipeline_mode = #tpu.pipeline_mode<synchronous>, transform_indices = @transform_1, window_bounds = array<i64: 1, 128>}, {pipeline_mode = #tpu.pipeline_mode<synchronous>, transform_indices = @transform_2, window_bounds = array<i64: 1, 128>}, {transform_indices = @transform_3, window_bounds = array<i64: 16, 128>}]} {
    %c0 = arith.constant 0 : index
    %c0_0 = arith.constant 0 : index
    %0 = vector.load %arg1[%c0, %c0_0] : memref<16x128xf32, #tpu.memory_space<vmem>>, vector<16x128xf32>
    %cst = arith.constant dense<0.000000e+00> : vector<16xf32>
    %1 = vector.multi_reduction <add>, %0, %cst [1] : vector<16x128xf32> to vector<16xf32>
    %2 = vector.shape_cast %1 : vector<16xf32> to vector<16x1xf32>
    %cst_1 = arith.constant 1.280000e+02 : f32
    %3 = vector.broadcast %cst_1 : f32 to vector<16x1xf32>
    %4 = arith.divf %2, %3 : vector<16x1xf32>
    %5 = vector.broadcast %4 : vector<16x1xf32> to vector<16x128xf32>
    %6 = arith.subf %0, %5 : vector<16x128xf32>
    %7 = arith.mulf %6, %6 : vector<16x128xf32>
    %cst_2 = arith.constant dense<0.000000e+00> : vector<16xf32>
    %8 = vector.multi_reduction <add>, %7, %cst_2 [1] : vector<16x128xf32> to vector<16xf32>
    %9 = vector.shape_cast %8 : vector<16xf32> to vector<16x1xf32>
    %cst_3 = arith.constant 1.280000e+02 : f32
    %10 = vector.broadcast %cst_3 : f32 to vector<16x1xf32>
    %11 = arith.divf %9, %10 : vector<16x1xf32>
    %cst_4 = arith.constant 9.99999996E-13 : f32
    %12 = vector.broadcast %cst_4 : f32 to vector<16x1xf32>
    %13 = arith.addf %11, %12 : vector<16x1xf32>
    %14 = math.rsqrt %13 : vector<16x1xf32>
    %15 = vector.broadcast %4 : vector<16x1xf32> to vector<16x128xf32>
    %16 = arith.subf %0, %15 : vector<16x128xf32>
    %17 = vector.broadcast %14 : vector<16x1xf32> to vector<16x128xf32>
    %18 = arith.mulf %16, %17 : vector<16x128xf32>
    %c0_5 = arith.constant 0 : index
    %c0_6 = arith.constant 0 : index
    %19 = vector.load %arg2[%c0_5, %c0_6] : memref<1x128xf32, #tpu.memory_space<vmem>>, vector<1x128xf32>
    %20 = vector.broadcast %19 : vector<1x128xf32> to vector<16x128xf32>
    %21 = arith.mulf %18, %20 : vector<16x128xf32>
    %c0_7 = arith.constant 0 : index
    %c0_8 = arith.constant 0 : index
    %22 = vector.load %arg3[%c0_7, %c0_8] : memref<1x128xf32, #tpu.memory_space<vmem>>, vector<1x128xf32>
    %23 = vector.broadcast %22 : vector<1x128xf32> to vector<16x128xf32>
    %24 = arith.addf %21, %23 : vector<16x128xf32>
    %25 = arith.truncf %24 : vector<16x128xf32> to vector<16x128xbf16>
    %c0_9 = arith.constant 0 : index
    %c0_10 = arith.constant 0 : index
    %26 = vector.load %arg4[%c0_9, %c0_10] : memref<16x128xbf16, #tpu.memory_space<vmem>>, vector<16x128xbf16>
    tpu.vector_store %arg4[%c0_9, %c0_10], %25 {strides = array<i32>} : memref<16x128xbf16, #tpu.memory_space<vmem>>, vector<16x128xbf16>,
    return
  }
  func.func @transform_0(%arg0: i32) -> (i32, i32) {
    %c0_i32 = arith.constant 0 : i32
    %c0_i32_0 = arith.constant 0 : i32
    return %arg0, %c0_i32 : i32, i32
  }
  func.func @transform_1(%arg0: i32) -> (i32, i32) {
    %c0_i32 = arith.constant 0 : i32
    %c0_i32_0 = arith.constant 0 : i32
    %c0_i32_1 = arith.constant 0 : i32
    return %c0_i32, %c0_i32_0 : i32, i32
  }
  func.func @transform_2(%arg0: i32) -> (i32, i32) {
    %c0_i32 = arith.constant 0 : i32
    %c0_i32_0 = arith.constant 0 : i32
    %c0_i32_1 = arith.constant 0 : i32
    return %c0_i32, %c0_i32_0 : i32, i32
  }
  func.func @transform_3(%arg0: i32) -> (i32, i32) {
    %c0_i32 = arith.constant 0 : i32
    %c0_i32_0 = arith.constant 0 : i32
    return %arg0, %c0_i32 : i32, i32
  }
}

module attributes {stable_mosaic.version = 11 : i64} {
  func.func @_linear_resident_kernel(%arg0: i32, %arg1: i32, %arg2: memref<16x128xbf16, #tpu.memory_space<vmem>>, %arg3: memref<128x384xbf16, #tpu.memory_space<vmem>>, %arg4: memref<1x384xf32, #tpu.memory_space<vmem>>, %arg5: memref<16x384xbf16, #tpu.memory_space<vmem>>) attributes {dimension_semantics = [#tpu.dimension_semantics<parallel>, #tpu.dimension_semantics<parallel>], iteration_bounds = array<i64: 1, 1>, scalar_prefetch = 0 : i64, scratch_operands = 0 : i64, tpu.core_type = #tpu.core_type<tc>, window_params = [{transform_indices = @transform_0, window_bounds = array<i64: 16, 128>}, {transform_indices = @transform_1, window_bounds = array<i64: 128, 384>}, {transform_indices = @transform_2, window_bounds = array<i64: 1, 384>}, {transform_indices = @transform_3, window_bounds = array<i64: 16, 384>}]} {
    %c0 = arith.constant 0 : index
    %c0_0 = arith.constant 0 : index
    %0 = vector.load %arg2[%c0, %c0_0] : memref<16x128xbf16, #tpu.memory_space<vmem>>, vector<16x128xbf16>
    %c0_1 = arith.constant 0 : index
    %c0_2 = arith.constant 0 : index
    %1 = vector.load %arg3[%c0_1, %c0_2] : memref<128x384xbf16, #tpu.memory_space<vmem>>, vector<128x384xbf16>
    %cst = arith.constant dense<0.000000e+00> : vector<16x384xf32>
    %2 = tpu.matmul %0, %1, %cst {dimension_numbers = #tpu.dot_dimension_numbers<[1], [0], [0], [1], [0, 0, 1, 1], [], []>} : vector<16x128xbf16>, vector<128x384xbf16>, vector<16x384xf32> -> vector<16x384xf32>
    %c0_3 = arith.constant 0 : index
    %c0_4 = arith.constant 0 : index
    %3 = vector.load %arg4[%c0_3, %c0_4] : memref<1x384xf32, #tpu.memory_space<vmem>>, vector<1x384xf32>
    %4 = vector.broadcast %3 : vector<1x384xf32> to vector<16x384xf32>
    %5 = arith.addf %2, %4 : vector<16x384xf32>
    %6 = arith.truncf %5 : vector<16x384xf32> to vector<16x384xbf16>
    %c0_5 = arith.constant 0 : index
    %c0_6 = arith.constant 0 : index
    %7 = vector.load %arg5[%c0_5, %c0_6] : memref<16x384xbf16, #tpu.memory_space<vmem>>, vector<16x384xbf16>
    tpu.vector_store %arg5[%c0_5, %c0_6], %6 {strides = array<i32>} : memref<16x384xbf16, #tpu.memory_space<vmem>>, vector<16x384xbf16>,
    return
  }
  func.func @transform_0(%arg0: i32, %arg1: i32) -> (i32, i32) {
    %c0_i32 = arith.constant 0 : i32
    %c0_i32_0 = arith.constant 0 : i32
    return %arg0, %c0_i32 : i32, i32
  }
  func.func @transform_1(%arg0: i32, %arg1: i32) -> (i32, i32) {
    %c0_i32 = arith.constant 0 : i32
    %c0_i32_0 = arith.constant 0 : i32
    return %c0_i32, %arg1 : i32, i32
  }
  func.func @transform_2(%arg0: i32, %arg1: i32) -> (i32, i32) {
    %c0_i32 = arith.constant 0 : i32
    %c0_i32_0 = arith.constant 0 : i32
    return %c0_i32, %arg1 : i32, i32
  }
  func.func @transform_3(%arg0: i32, %arg1: i32) -> (i32, i32) {
    %c0_i32 = arith.constant 0 : i32
    return %arg0, %arg1 : i32, i32
  }
}

module attributes {stable_mosaic.version = 11 : i64} {
  func.func @_linear_res_ln_resident_kernel(%arg0: i32, %arg1: memref<16x128xbf16, #tpu.memory_space<vmem>>, %arg2: memref<128x128xbf16, #tpu.memory_space<vmem>>, %arg3: memref<1x128xf32, #tpu.memory_space<vmem>>, %arg4: memref<16x128xbf16, #tpu.memory_space<vmem>>, %arg5: memref<1x128xf32, #tpu.memory_space<vmem>>, %arg6: memref<1x128xf32, #tpu.memory_space<vmem>>, %arg7: memref<16x128xbf16, #tpu.memory_space<vmem>>) attributes {dimension_semantics = [#tpu.dimension_semantics<parallel>], iteration_bounds = array<i64: 1>, scalar_prefetch = 0 : i64, scratch_operands = 0 : i64, tpu.core_type = #tpu.core_type<tc>, window_params = [{transform_indices = @transform_0, window_bounds = array<i64: 16, 128>}, {pipeline_mode = #tpu.pipeline_mode<synchronous>, transform_indices = @transform_1, window_bounds = array<i64: 128, 128>}, {pipeline_mode = #tpu.pipeline_mode<synchronous>, transform_indices = @transform_2, window_bounds = array<i64: 1, 128>}, {transform_indices = @transform_3, window_bounds = array<i64: 16, 128>}, {pipeline_mode = #tpu.pipeline_mode<synchronous>, transform_indices = @transform_4, window_bounds = array<i64: 1, 128>}, {pipeline_mode = #tpu.pipeline_mode<synchronous>, transform_indices = @transform_5, window_bounds = array<i64: 1, 128>}, {transform_indices = @transform_6, window_bounds = array<i64: 16, 128>}]} {
    %c0 = arith.constant 0 : index
    %c0_0 = arith.constant 0 : index
    %0 = vector.load %arg1[%c0, %c0_0] : memref<16x128xbf16, #tpu.memory_space<vmem>>, vector<16x128xbf16>
    %c0_1 = arith.constant 0 : index
    %c0_2 = arith.constant 0 : index
    %1 = vector.load %arg2[%c0_1, %c0_2] : memref<128x128xbf16, #tpu.memory_space<vmem>>, vector<128x128xbf16>
    %cst = arith.constant dense<0.000000e+00> : vector<16x128xf32>
    %2 = tpu.matmul %0, %1, %cst {dimension_numbers = #tpu.dot_dimension_numbers<[1], [0], [0], [1], [0, 0, 1, 1], [], []>} : vector<16x128xbf16>, vector<128x128xbf16>, vector<16x128xf32> -> vector<16x128xf32>
    %c0_3 = arith.constant 0 : index
    %c0_4 = arith.constant 0 : index
    %3 = vector.load %arg3[%c0_3, %c0_4] : memref<1x128xf32, #tpu.memory_space<vmem>>, vector<1x128xf32>
    %4 = vector.broadcast %3 : vector<1x128xf32> to vector<16x128xf32>
    %5 = arith.addf %2, %4 : vector<16x128xf32>
    %c0_5 = arith.constant 0 : index
    %c0_6 = arith.constant 0 : index
    %6 = vector.load %arg4[%c0_5, %c0_6] : memref<16x128xbf16, #tpu.memory_space<vmem>>, vector<16x128xbf16>
    %7 = arith.extf %6 : vector<16x128xbf16> to vector<16x128xf32>
    %8 = arith.addf %5, %7 : vector<16x128xf32>
    %cst_7 = arith.constant dense<0.000000e+00> : vector<16xf32>
    %9 = vector.multi_reduction <add>, %8, %cst_7 [1] : vector<16x128xf32> to vector<16xf32>
    %10 = vector.shape_cast %9 : vector<16xf32> to vector<16x1xf32>
    %cst_8 = arith.constant 1.280000e+02 : f32
    %11 = vector.broadcast %cst_8 : f32 to vector<16x1xf32>
    %12 = arith.divf %10, %11 : vector<16x1xf32>
    %13 = vector.broadcast %12 : vector<16x1xf32> to vector<16x128xf32>
    %14 = arith.subf %8, %13 : vector<16x128xf32>
    %15 = arith.mulf %14, %14 : vector<16x128xf32>
    %cst_9 = arith.constant dense<0.000000e+00> : vector<16xf32>
    %16 = vector.multi_reduction <add>, %15, %cst_9 [1] : vector<16x128xf32> to vector<16xf32>
    %17 = vector.shape_cast %16 : vector<16xf32> to vector<16x1xf32>
    %cst_10 = arith.constant 1.280000e+02 : f32
    %18 = vector.broadcast %cst_10 : f32 to vector<16x1xf32>
    %19 = arith.divf %17, %18 : vector<16x1xf32>
    %cst_11 = arith.constant 9.99999996E-13 : f32
    %20 = vector.broadcast %cst_11 : f32 to vector<16x1xf32>
    %21 = arith.addf %19, %20 : vector<16x1xf32>
    %22 = math.rsqrt %21 : vector<16x1xf32>
    %23 = vector.broadcast %12 : vector<16x1xf32> to vector<16x128xf32>
    %24 = arith.subf %8, %23 : vector<16x128xf32>
    %25 = vector.broadcast %22 : vector<16x1xf32> to vector<16x128xf32>
    %26 = arith.mulf %24, %25 : vector<16x128xf32>
    %c0_12 = arith.constant 0 : index
    %c0_13 = arith.constant 0 : index
    %27 = vector.load %arg5[%c0_12, %c0_13] : memref<1x128xf32, #tpu.memory_space<vmem>>, vector<1x128xf32>
    %28 = vector.broadcast %27 : vector<1x128xf32> to vector<16x128xf32>
    %29 = arith.mulf %26, %28 : vector<16x128xf32>
    %c0_14 = arith.constant 0 : index
    %c0_15 = arith.constant 0 : index
    %30 = vector.load %arg6[%c0_14, %c0_15] : memref<1x128xf32, #tpu.memory_space<vmem>>, vector<1x128xf32>
    %31 = vector.broadcast %30 : vector<1x128xf32> to vector<16x128xf32>
    %32 = arith.addf %29, %31 : vector<16x128xf32>
    %33 = arith.truncf %32 : vector<16x128xf32> to vector<16x128xbf16>
    %c0_16 = arith.constant 0 : index
    %c0_17 = arith.constant 0 : index
    %34 = vector.load %arg7[%c0_16, %c0_17] : memref<16x128xbf16, #tpu.memory_space<vmem>>, vector<16x128xbf16>
    tpu.vector_store %arg7[%c0_16, %c0_17], %33 {strides = array<i32>} : memref<16x128xbf16, #tpu.memory_space<vmem>>, vector<16x128xbf16>,
    return
  }
  func.func @transform_0(%arg0: i32) -> (i32, i32) {
    %c0_i32 = arith.constant 0 : i32
    %c0_i32_0 = arith.constant 0 : i32
    return %arg0, %c0_i32 : i32, i32
  }
  func.func @transform_1(%arg0: i32) -> (i32, i32) {
    %c0_i32 = arith.constant 0 : i32
    %c0_i32_0 = arith.constant 0 : i32
    %c0_i32_1 = arith.constant 0 : i32
    return %c0_i32, %c0_i32_0 : i32, i32
  }
  func.func @transform_2(%arg0: i32) -> (i32, i32) {
    %c0_i32 = arith.constant 0 : i32
    %c0_i32_0 = arith.constant 0 : i32
    %c0_i32_1 = arith.constant 0 : i32
    return %c0_i32, %c0_i32_0 : i32, i32
  }
  func.func @transform_3(%arg0: i32) -> (i32, i32) {
    %c0_i32 = arith.constant 0 : i32
    %c0_i32_0 = arith.constant 0 : i32
    return %arg0, %c0_i32 : i32, i32
  }
  func.func @transform_4(%arg0: i32) -> (i32, i32) {
    %c0_i32 = arith.constant 0 : i32
    %c0_i32_0 = arith.constant 0 : i32
    %c0_i32_1 = arith.constant 0 : i32
    return %c0_i32, %c0_i32_0 : i32, i32
  }
  func.func @transform_5(%arg0: i32) -> (i32, i32) {
    %c0_i32 = arith.constant 0 : i32
    %c0_i32_0 = arith.constant 0 : i32
    %c0_i32_1 = arith.constant 0 : i32
    return %c0_i32, %c0_i32_0 : i32, i32
  }
  func.func @transform_6(%arg0: i32) -> (i32, i32) {
    %c0_i32 = arith.constant 0 : i32
    %c0_i32_0 = arith.constant 0 : i32
    return %arg0, %c0_i32 : i32, i32
  }
}

module attributes {stable_mosaic.version = 11 : i64} {
  func.func @_attn_kernel(%arg0: i32, %arg1: i32, %arg2: memref<1x8x128xbf16, #tpu.memory_space<vmem>>, %arg3: memref<1x8x128xbf16, #tpu.memory_space<vmem>>, %arg4: memref<1x8x128xbf16, #tpu.memory_space<vmem>>, %arg5: memref<1x1x8xf32, #tpu.memory_space<vmem>>, %arg6: memref<1x8x128xbf16, #tpu.memory_space<vmem>>) attributes {dimension_semantics = [#tpu.dimension_semantics<parallel>, #tpu.dimension_semantics<parallel>], iteration_bounds = array<i64: 2, 1>, scalar_prefetch = 0 : i64, scratch_operands = 0 : i64, tpu.core_type = #tpu.core_type<tc>, window_params = [{transform_indices = @transform_0, window_bounds = array<i64: 1, 8, 128>}, {transform_indices = @transform_1, window_bounds = array<i64: 1, 8, 128>}, {transform_indices = @transform_2, window_bounds = array<i64: 1, 8, 128>}, {transform_indices = @transform_3, window_bounds = array<i64: 1, 1, 8>}, {transform_indices = @transform_4, window_bounds = array<i64: 1, 8, 128>}]} {
    %c0 = arith.constant 0 : index
    %c0_0 = arith.constant 0 : index
    %c0_1 = arith.constant 0 : index
    %0 = vector.load %arg5[%c0, %c0_0, %c0_1] : memref<1x1x8xf32, #tpu.memory_space<vmem>>, vector<1x1x8xf32>
    %1 = vector.shape_cast %0 : vector<1x1x8xf32> to vector<1x8xf32>
    %c0_2 = arith.constant 0 : index
    %c0_3 = arith.constant 0 : index
    %c0_4 = arith.constant 0 : index
    %2 = vector.load %arg2[%c0_2, %c0_3, %c0_4] : memref<1x8x128xbf16, #tpu.memory_space<vmem>>, vector<1x8x64xbf16>
    %3 = vector.shape_cast %2 : vector<1x8x64xbf16> to vector<8x64xbf16>
    %c0_5 = arith.constant 0 : index
    %c0_6 = arith.constant 0 : index
    %c0_7 = arith.constant 0 : index
    %4 = vector.load %arg3[%c0_5, %c0_6, %c0_7] : memref<1x8x128xbf16, #tpu.memory_space<vmem>>, vector<1x8x64xbf16>
    %5 = vector.shape_cast %4 : vector<1x8x64xbf16> to vector<8x64xbf16>
    %c0_8 = arith.constant 0 : index
    %c0_9 = arith.constant 0 : index
    %c0_10 = arith.constant 0 : index
    %6 = vector.load %arg4[%c0_8, %c0_9, %c0_10] : memref<1x8x128xbf16, #tpu.memory_space<vmem>>, vector<1x8x64xbf16>
    %7 = vector.shape_cast %6 : vector<1x8x64xbf16> to vector<8x64xbf16>
    %cst = arith.constant dense<0.000000e+00> : vector<8x8xf32>
    %8 = tpu.matmul %3, %5, %cst {dimension_numbers = #tpu.dot_dimension_numbers<[1], [1], [0], [0], [0, 0, 1, 0], [], []>} : vector<8x64xbf16>, vector<8x64xbf16>, vector<8x8xf32> -> vector<8x8xf32>
    %cst_11 = arith.constant 1.250000e-01 : f32
    %9 = vector.broadcast %cst_11 : f32 to vector<8x8xf32>
    %10 = arith.mulf %8, %9 : vector<8x8xf32>
    %11 = vector.broadcast %1 : vector<1x8xf32> to vector<8x8xf32>
    %12 = arith.addf %10, %11 : vector<8x8xf32>
    %cst_12 = arith.constant dense<0xFF800000> : vector<8xf32>
    %13 = vector.multi_reduction <maximumf>, %12, %cst_12 [1] : vector<8x8xf32> to vector<8xf32>
    %14 = vector.shape_cast %13 : vector<8xf32> to vector<8x1xf32>
    %15 = vector.broadcast %14 : vector<8x1xf32> to vector<8x8xf32>
    %16 = arith.subf %12, %15 : vector<8x8xf32>
    %17 = math.exp %16 : vector<8x8xf32>
    %cst_13 = arith.constant dense<0.000000e+00> : vector<8xf32>
    %18 = vector.multi_reduction <add>, %17, %cst_13 [1] : vector<8x8xf32> to vector<8xf32>
    %19 = vector.shape_cast %18 : vector<8xf32> to vector<8x1xf32>
    %20 = tpu.reciprocal %19 {approx = true} : vector<8x1xf32> -> vector<8x1xf32>
    %21 = vector.broadcast %20 : vector<8x1xf32> to vector<8x8xf32>
    %22 = arith.mulf %17, %21 : vector<8x8xf32>
    %23 = arith.truncf %22 : vector<8x8xf32> to vector<8x8xbf16>
    %cst_14 = arith.constant dense<0.000000e+00> : vector<8x64xf32>
    %24 = tpu.matmul %23, %7, %cst_14 {dimension_numbers = #tpu.dot_dimension_numbers<[1], [0], [0], [1], [0, 0, 1, 1], [], []>} : vector<8x8xbf16>, vector<8x64xbf16>, vector<8x64xf32> -> vector<8x64xf32>
    %25 = arith.truncf %24 : vector<8x64xf32> to vector<8x64xbf16>
    %c0_15 = arith.constant 0 : index
    %c0_16 = arith.constant 0 : index
    %c0_17 = arith.constant 0 : index
    %26 = vector.load %arg6[%c0_15, %c0_16, %c0_17] : memref<1x8x128xbf16, #tpu.memory_space<vmem>>, vector<1x8x64xbf16>
    %27 = vector.shape_cast %26 : vector<1x8x64xbf16> to vector<8x64xbf16>
    %28 = vector.shape_cast %25 : vector<8x64xbf16> to vector<1x8x64xbf16>
    tpu.vector_store %arg6[%c0_15, %c0_16, %c0_17], %28 {strides = array<i32>} : memref<1x8x128xbf16, #tpu.memory_space<vmem>>, vector<1x8x64xbf16>,
    %c0_18 = arith.constant 0 : index
    %c0_19 = arith.constant 0 : index
    %c64 = arith.constant 64 : index
    %29 = vector.load %arg2[%c0_18, %c0_19, %c64] : memref<1x8x128xbf16, #tpu.memory_space<vmem>>, vector<1x8x64xbf16>
    %30 = vector.shape_cast %29 : vector<1x8x64xbf16> to vector<8x64xbf16>
    %c0_20 = arith.constant 0 : index
    %c0_21 = arith.constant 0 : index
    %c64_22 = arith.constant 64 : index
    %31 = vector.load %arg3[%c0_20, %c0_21, %c64_22] : memref<1x8x128xbf16, #tpu.memory_space<vmem>>, vector<1x8x64xbf16>
    %32 = vector.shape_cast %31 : vector<1x8x64xbf16> to vector<8x64xbf16>
    %c0_23 = arith.constant 0 : index
    %c0_24 = arith.constant 0 : index
    %c64_25 = arith.constant 64 : index
    %33 = vector.load %arg4[%c0_23, %c0_24, %c64_25] : memref<1x8x128xbf16, #tpu.memory_space<vmem>>, vector<1x8x64xbf16>
    %34 = vector.shape_cast %33 : vector<1x8x64xbf16> to vector<8x64xbf16>
    %cst_26 = arith.constant dense<0.000000e+00> : vector<8x8xf32>
    %35 = tpu.matmul %30, %32, %cst_26 {dimension_numbers = #tpu.dot_dimension_numbers<[1], [1], [0], [0], [0, 0, 1, 0], [], []>} : vector<8x64xbf16>, vector<8x64xbf16>, vector<8x8xf32> -> vector<8x8xf32>
    %cst_27 = arith.constant 1.250000e-01 : f32
    %36 = vector.broadcast %cst_27 : f32 to vector<8x8xf32>
    %37 = arith.mulf %35, %36 : vector<8x8xf32>
    %38 = vector.broadcast %1 : vector<1x8xf32> to vector<8x8xf32>
    %39 = arith.addf %37, %38 : vector<8x8xf32>
    %cst_28 = arith.constant dense<0xFF800000> : vector<8xf32>
    %40 = vector.multi_reduction <maximumf>, %39, %cst_28 [1] : vector<8x8xf32> to vector<8xf32>
    %41 = vector.shape_cast %40 : vector<8xf32> to vector<8x1xf32>
    %42 = vector.broadcast %41 : vector<8x1xf32> to vector<8x8xf32>
    %43 = arith.subf %39, %42 : vector<8x8xf32>
    %44 = math.exp %43 : vector<8x8xf32>
    %cst_29 = arith.constant dense<0.000000e+00> : vector<8xf32>
    %45 = vector.multi_reduction <add>, %44, %cst_29 [1] : vector<8x8xf32> to vector<8xf32>
    %46 = vector.shape_cast %45 : vector<8xf32> to vector<8x1xf32>
    %47 = tpu.reciprocal %46 {approx = true} : vector<8x1xf32> -> vector<8x1xf32>
    %48 = vector.broadcast %47 : vector<8x1xf32> to vector<8x8xf32>
    %49 = arith.mulf %44, %48 : vector<8x8xf32>
    %50 = arith.truncf %49 : vector<8x8xf32> to vector<8x8xbf16>
    %cst_30 = arith.constant dense<0.000000e+00> : vector<8x64xf32>
    %51 = tpu.matmul %50, %34, %cst_30 {dimension_numbers = #tpu.dot_dimension_numbers<[1], [0], [0], [1], [0, 0, 1, 1], [], []>} : vector<8x8xbf16>, vector<8x64xbf16>, vector<8x64xf32> -> vector<8x64xf32>
    %52 = arith.truncf %51 : vector<8x64xf32> to vector<8x64xbf16>
    %c0_31 = arith.constant 0 : index
    %c0_32 = arith.constant 0 : index
    %c64_33 = arith.constant 64 : index
    %53 = vector.load %arg6[%c0_31, %c0_32, %c64_33] : memref<1x8x128xbf16, #tpu.memory_space<vmem>>, vector<1x8x64xbf16>
    %54 = vector.shape_cast %53 : vector<1x8x64xbf16> to vector<8x64xbf16>
    %55 = vector.shape_cast %52 : vector<8x64xbf16> to vector<1x8x64xbf16>
    tpu.vector_store %arg6[%c0_31, %c0_32, %c64_33], %55 {strides = array<i32>} : memref<1x8x128xbf16, #tpu.memory_space<vmem>>, vector<1x8x64xbf16>,
    return
  }
  func.func @transform_0(%arg0: i32, %arg1: i32) -> (i32, i32, i32) {
    %c0_i32 = arith.constant 0 : i32
    %c0_i32_0 = arith.constant 0 : i32
    return %arg0, %c0_i32, %arg1 : i32, i32, i32
  }
  func.func @transform_1(%arg0: i32, %arg1: i32) -> (i32, i32, i32) {
    %c1_i32 = arith.constant 1 : i32
    %0 = arith.addi %c1_i32, %arg1 : i32
    %c0_i32 = arith.constant 0 : i32
    %c0_i32_0 = arith.constant 0 : i32
    return %arg0, %c0_i32, %0 : i32, i32, i32
  }
  func.func @transform_2(%arg0: i32, %arg1: i32) -> (i32, i32, i32) {
    %c2_i32 = arith.constant 2 : i32
    %0 = arith.addi %c2_i32, %arg1 : i32
    %c0_i32 = arith.constant 0 : i32
    %c0_i32_0 = arith.constant 0 : i32
    return %arg0, %c0_i32, %0 : i32, i32, i32
  }
  func.func @transform_3(%arg0: i32, %arg1: i32) -> (i32, i32, i32) {
    %c0_i32 = arith.constant 0 : i32
    %c0_i32_0 = arith.constant 0 : i32
    %c0_i32_1 = arith.constant 0 : i32
    return %arg0, %c0_i32, %c0_i32_0 : i32, i32, i32
  }
  func.func @transform_4(%arg0: i32, %arg1: i32) -> (i32, i32, i32) {
    %c0_i32 = arith.constant 0 : i32
    %c0_i32_0 = arith.constant 0 : i32
    return %arg0, %c0_i32, %arg1 : i32, i32, i32
  }
}

module attributes {stable_mosaic.version = 11 : i64} {
  func.func @_linear_resident_kernel(%arg0: i32, %arg1: i32, %arg2: memref<16x128xbf16, #tpu.memory_space<vmem>>, %arg3: memref<128x512xbf16, #tpu.memory_space<vmem>>, %arg4: memref<1x512xf32, #tpu.memory_space<vmem>>, %arg5: memref<16x512xbf16, #tpu.memory_space<vmem>>) attributes {dimension_semantics = [#tpu.dimension_semantics<parallel>, #tpu.dimension_semantics<parallel>], iteration_bounds = array<i64: 1, 1>, scalar_prefetch = 0 : i64, scratch_operands = 0 : i64, tpu.core_type = #tpu.core_type<tc>, window_params = [{transform_indices = @transform_0, window_bounds = array<i64: 16, 128>}, {transform_indices = @transform_1, window_bounds = array<i64: 128, 512>}, {transform_indices = @transform_2, window_bounds = array<i64: 1, 512>}, {transform_indices = @transform_3, window_bounds = array<i64: 16, 512>}]} {
    %c0 = arith.constant 0 : index
    %c0_0 = arith.constant 0 : index
    %0 = vector.load %arg2[%c0, %c0_0] : memref<16x128xbf16, #tpu.memory_space<vmem>>, vector<16x128xbf16>
    %c0_1 = arith.constant 0 : index
    %c0_2 = arith.constant 0 : index
    %1 = vector.load %arg3[%c0_1, %c0_2] : memref<128x512xbf16, #tpu.memory_space<vmem>>, vector<128x512xbf16>
    %cst = arith.constant dense<0.000000e+00> : vector<16x512xf32>
    %2 = tpu.matmul %0, %1, %cst {dimension_numbers = #tpu.dot_dimension_numbers<[1], [0], [0], [1], [0, 0, 1, 1], [], []>} : vector<16x128xbf16>, vector<128x512xbf16>, vector<16x512xf32> -> vector<16x512xf32>
    %c0_3 = arith.constant 0 : index
    %c0_4 = arith.constant 0 : index
    %3 = vector.load %arg4[%c0_3, %c0_4] : memref<1x512xf32, #tpu.memory_space<vmem>>, vector<1x512xf32>
    %4 = vector.broadcast %3 : vector<1x512xf32> to vector<16x512xf32>
    %5 = arith.addf %2, %4 : vector<16x512xf32>
    %cst_5 = arith.constant 5.000000e-01 : f32
    %6 = vector.broadcast %cst_5 : f32 to vector<16x512xf32>
    %7 = arith.mulf %6, %5 : vector<16x512xf32>
    %cst_6 = arith.constant 0.707106769 : f32
    %8 = vector.broadcast %cst_6 : f32 to vector<16x512xf32>
    %9 = arith.mulf %5, %8 : vector<16x512xf32>
    %10 = math.erf %9 : vector<16x512xf32>
    %cst_7 = arith.constant 1.000000e+00 : f32
    %11 = vector.broadcast %cst_7 : f32 to vector<16x512xf32>
    %12 = arith.addf %11, %10 : vector<16x512xf32>
    %13 = arith.mulf %7, %12 : vector<16x512xf32>
    %14 = arith.truncf %13 : vector<16x512xf32> to vector<16x512xbf16>
    %c0_8 = arith.constant 0 : index
    %c0_9 = arith.constant 0 : index
    %15 = vector.load %arg5[%c0_8, %c0_9] : memref<16x512xbf16, #tpu.memory_space<vmem>>, vector<16x512xbf16>
    tpu.vector_store %arg5[%c0_8, %c0_9], %14 {strides = array<i32>} : memref<16x512xbf16, #tpu.memory_space<vmem>>, vector<16x512xbf16>,
    return
  }
  func.func @transform_0(%arg0: i32, %arg1: i32) -> (i32, i32) {
    %c0_i32 = arith.constant 0 : i32
    %c0_i32_0 = arith.constant 0 : i32
    return %arg0, %c0_i32 : i32, i32
  }
  func.func @transform_1(%arg0: i32, %arg1: i32) -> (i32, i32) {
    %c0_i32 = arith.constant 0 : i32
    %c0_i32_0 = arith.constant 0 : i32
    return %c0_i32, %arg1 : i32, i32
  }
  func.func @transform_2(%arg0: i32, %arg1: i32) -> (i32, i32) {
    %c0_i32 = arith.constant 0 : i32
    %c0_i32_0 = arith.constant 0 : i32
    return %c0_i32, %arg1 : i32, i32
  }
  func.func @transform_3(%arg0: i32, %arg1: i32) -> (i32, i32) {
    %c0_i32 = arith.constant 0 : i32
    return %arg0, %arg1 : i32, i32
  }
}

module attributes {stable_mosaic.version = 11 : i64} {
  func.func @_linear_res_ln_resident_kernel(%arg0: i32, %arg1: memref<16x512xbf16, #tpu.memory_space<vmem>>, %arg2: memref<512x128xbf16, #tpu.memory_space<vmem>>, %arg3: memref<1x128xf32, #tpu.memory_space<vmem>>, %arg4: memref<16x128xbf16, #tpu.memory_space<vmem>>, %arg5: memref<1x128xf32, #tpu.memory_space<vmem>>, %arg6: memref<1x128xf32, #tpu.memory_space<vmem>>, %arg7: memref<16x128xbf16, #tpu.memory_space<vmem>>) attributes {dimension_semantics = [#tpu.dimension_semantics<parallel>], iteration_bounds = array<i64: 1>, scalar_prefetch = 0 : i64, scratch_operands = 0 : i64, tpu.core_type = #tpu.core_type<tc>, window_params = [{transform_indices = @transform_0, window_bounds = array<i64: 16, 512>}, {pipeline_mode = #tpu.pipeline_mode<synchronous>, transform_indices = @transform_1, window_bounds = array<i64: 512, 128>}, {pipeline_mode = #tpu.pipeline_mode<synchronous>, transform_indices = @transform_2, window_bounds = array<i64: 1, 128>}, {transform_indices = @transform_3, window_bounds = array<i64: 16, 128>}, {pipeline_mode = #tpu.pipeline_mode<synchronous>, transform_indices = @transform_4, window_bounds = array<i64: 1, 128>}, {pipeline_mode = #tpu.pipeline_mode<synchronous>, transform_indices = @transform_5, window_bounds = array<i64: 1, 128>}, {transform_indices = @transform_6, window_bounds = array<i64: 16, 128>}]} {
    %c0 = arith.constant 0 : index
    %c0_0 = arith.constant 0 : index
    %0 = vector.load %arg1[%c0, %c0_0] : memref<16x512xbf16, #tpu.memory_space<vmem>>, vector<16x512xbf16>
    %c0_1 = arith.constant 0 : index
    %c0_2 = arith.constant 0 : index
    %1 = vector.load %arg2[%c0_1, %c0_2] : memref<512x128xbf16, #tpu.memory_space<vmem>>, vector<512x128xbf16>
    %cst = arith.constant dense<0.000000e+00> : vector<16x128xf32>
    %2 = tpu.matmul %0, %1, %cst {dimension_numbers = #tpu.dot_dimension_numbers<[1], [0], [0], [1], [0, 0, 1, 1], [], []>} : vector<16x512xbf16>, vector<512x128xbf16>, vector<16x128xf32> -> vector<16x128xf32>
    %c0_3 = arith.constant 0 : index
    %c0_4 = arith.constant 0 : index
    %3 = vector.load %arg3[%c0_3, %c0_4] : memref<1x128xf32, #tpu.memory_space<vmem>>, vector<1x128xf32>
    %4 = vector.broadcast %3 : vector<1x128xf32> to vector<16x128xf32>
    %5 = arith.addf %2, %4 : vector<16x128xf32>
    %c0_5 = arith.constant 0 : index
    %c0_6 = arith.constant 0 : index
    %6 = vector.load %arg4[%c0_5, %c0_6] : memref<16x128xbf16, #tpu.memory_space<vmem>>, vector<16x128xbf16>
    %7 = arith.extf %6 : vector<16x128xbf16> to vector<16x128xf32>
    %8 = arith.addf %5, %7 : vector<16x128xf32>
    %cst_7 = arith.constant dense<0.000000e+00> : vector<16xf32>
    %9 = vector.multi_reduction <add>, %8, %cst_7 [1] : vector<16x128xf32> to vector<16xf32>
    %10 = vector.shape_cast %9 : vector<16xf32> to vector<16x1xf32>
    %cst_8 = arith.constant 1.280000e+02 : f32
    %11 = vector.broadcast %cst_8 : f32 to vector<16x1xf32>
    %12 = arith.divf %10, %11 : vector<16x1xf32>
    %13 = vector.broadcast %12 : vector<16x1xf32> to vector<16x128xf32>
    %14 = arith.subf %8, %13 : vector<16x128xf32>
    %15 = arith.mulf %14, %14 : vector<16x128xf32>
    %cst_9 = arith.constant dense<0.000000e+00> : vector<16xf32>
    %16 = vector.multi_reduction <add>, %15, %cst_9 [1] : vector<16x128xf32> to vector<16xf32>
    %17 = vector.shape_cast %16 : vector<16xf32> to vector<16x1xf32>
    %cst_10 = arith.constant 1.280000e+02 : f32
    %18 = vector.broadcast %cst_10 : f32 to vector<16x1xf32>
    %19 = arith.divf %17, %18 : vector<16x1xf32>
    %cst_11 = arith.constant 9.99999996E-13 : f32
    %20 = vector.broadcast %cst_11 : f32 to vector<16x1xf32>
    %21 = arith.addf %19, %20 : vector<16x1xf32>
    %22 = math.rsqrt %21 : vector<16x1xf32>
    %23 = vector.broadcast %12 : vector<16x1xf32> to vector<16x128xf32>
    %24 = arith.subf %8, %23 : vector<16x128xf32>
    %25 = vector.broadcast %22 : vector<16x1xf32> to vector<16x128xf32>
    %26 = arith.mulf %24, %25 : vector<16x128xf32>
    %c0_12 = arith.constant 0 : index
    %c0_13 = arith.constant 0 : index
    %27 = vector.load %arg5[%c0_12, %c0_13] : memref<1x128xf32, #tpu.memory_space<vmem>>, vector<1x128xf32>
    %28 = vector.broadcast %27 : vector<1x128xf32> to vector<16x128xf32>
    %29 = arith.mulf %26, %28 : vector<16x128xf32>
    %c0_14 = arith.constant 0 : index
    %c0_15 = arith.constant 0 : index
    %30 = vector.load %arg6[%c0_14, %c0_15] : memref<1x128xf32, #tpu.memory_space<vmem>>, vector<1x128xf32>
    %31 = vector.broadcast %30 : vector<1x128xf32> to vector<16x128xf32>
    %32 = arith.addf %29, %31 : vector<16x128xf32>
    %33 = arith.truncf %32 : vector<16x128xf32> to vector<16x128xbf16>
    %c0_16 = arith.constant 0 : index
    %c0_17 = arith.constant 0 : index
    %34 = vector.load %arg7[%c0_16, %c0_17] : memref<16x128xbf16, #tpu.memory_space<vmem>>, vector<16x128xbf16>
    tpu.vector_store %arg7[%c0_16, %c0_17], %33 {strides = array<i32>} : memref<16x128xbf16, #tpu.memory_space<vmem>>, vector<16x128xbf16>,
    return
  }
  func.func @transform_0(%arg0: i32) -> (i32, i32) {
    %c0_i32 = arith.constant 0 : i32
    %c0_i32_0 = arith.constant 0 : i32
    return %arg0, %c0_i32 : i32, i32
  }
  func.func @transform_1(%arg0: i32) -> (i32, i32) {
    %c0_i32 = arith.constant 0 : i32
    %c0_i32_0 = arith.constant 0 : i32
    %c0_i32_1 = arith.constant 0 : i32
    return %c0_i32, %c0_i32_0 : i32, i32
  }
  func.func @transform_2(%arg0: i32) -> (i32, i32) {
    %c0_i32 = arith.constant 0 : i32
    %c0_i32_0 = arith.constant 0 : i32
    %c0_i32_1 = arith.constant 0 : i32
    return %c0_i32, %c0_i32_0 : i32, i32
  }
  func.func @transform_3(%arg0: i32) -> (i32, i32) {
    %c0_i32 = arith.constant 0 : i32
    %c0_i32_0 = arith.constant 0 : i32
    return %arg0, %c0_i32 : i32, i32
  }
  func.func @transform_4(%arg0: i32) -> (i32, i32) {
    %c0_i32 = arith.constant 0 : i32
    %c0_i32_0 = arith.constant 0 : i32
    %c0_i32_1 = arith.constant 0 : i32
    return %c0_i32, %c0_i32_0 : i32, i32
  }
  func.func @transform_5(%arg0: i32) -> (i32, i32) {
    %c0_i32 = arith.constant 0 : i32
    %c0_i32_0 = arith.constant 0 : i32
    %c0_i32_1 = arith.constant 0 : i32
    return %c0_i32, %c0_i32_0 : i32, i32
  }
  func.func @transform_6(%arg0: i32) -> (i32, i32) {
    %c0_i32 = arith.constant 0 : i32
    %c0_i32_0 = arith.constant 0 : i32
    return %arg0, %c0_i32 : i32, i32
  }
}

module attributes {stable_mosaic.version = 11 : i64} {
  func.func @_cls_head_kernel(%arg0: memref<2x128xbf16, #tpu.memory_space<vmem>>, %arg1: memref<128x128xbf16, #tpu.memory_space<vmem>>, %arg2: memref<1x128xf32, #tpu.memory_space<vmem>>, %arg3: memref<128x3xbf16, #tpu.memory_space<vmem>>, %arg4: memref<1x3xf32, #tpu.memory_space<vmem>>, %arg5: memref<2x3xf32, #tpu.memory_space<vmem>>, %arg6: memref<2x3xf32, #tpu.memory_space<vmem>>, %arg7: memref<1x1xf32, #tpu.memory_space<vmem>>) attributes {dimension_semantics = [], scalar_prefetch = 0 : i64, scratch_operands = 0 : i64, tpu.core_type = #tpu.core_type<tc>} {
    %c0 = arith.constant 0 : index
    %c0_0 = arith.constant 0 : index
    %0 = vector.load %arg0[%c0, %c0_0] : memref<2x128xbf16, #tpu.memory_space<vmem>>, vector<2x128xbf16>
    %c0_1 = arith.constant 0 : index
    %c0_2 = arith.constant 0 : index
    %1 = vector.load %arg1[%c0_1, %c0_2] : memref<128x128xbf16, #tpu.memory_space<vmem>>, vector<128x128xbf16>
    %cst = arith.constant dense<0.000000e+00> : vector<2x128xf32>
    %2 = tpu.matmul %0, %1, %cst {dimension_numbers = #tpu.dot_dimension_numbers<[1], [0], [0], [1], [0, 0, 1, 1], [], []>} : vector<2x128xbf16>, vector<128x128xbf16>, vector<2x128xf32> -> vector<2x128xf32>
    %c0_3 = arith.constant 0 : index
    %c0_4 = arith.constant 0 : index
    %3 = vector.load %arg2[%c0_3, %c0_4] : memref<1x128xf32, #tpu.memory_space<vmem>>, vector<1x128xf32>
    %4 = vector.broadcast %3 : vector<1x128xf32> to vector<2x128xf32>
    %5 = arith.addf %2, %4 : vector<2x128xf32>
    %6 = math.tanh %5 : vector<2x128xf32>
    %7 = arith.truncf %6 : vector<2x128xf32> to vector<2x128xbf16>
    %c0_5 = arith.constant 0 : index
    %c0_6 = arith.constant 0 : index
    %8 = vector.load %arg3[%c0_5, %c0_6] : memref<128x3xbf16, #tpu.memory_space<vmem>>, vector<128x3xbf16>
    %cst_7 = arith.constant dense<0.000000e+00> : vector<2x3xf32>
    %9 = tpu.matmul %7, %8, %cst_7 {dimension_numbers = #tpu.dot_dimension_numbers<[1], [0], [0], [1], [0, 0, 1, 1], [], []>} : vector<2x128xbf16>, vector<128x3xbf16>, vector<2x3xf32> -> vector<2x3xf32>
    %c0_8 = arith.constant 0 : index
    %c0_9 = arith.constant 0 : index
    %10 = vector.load %arg4[%c0_8, %c0_9] : memref<1x3xf32, #tpu.memory_space<vmem>>, vector<1x3xf32>
    %11 = vector.broadcast %10 : vector<1x3xf32> to vector<2x3xf32>
    %12 = arith.addf %9, %11 : vector<2x3xf32>
    %c0_10 = arith.constant 0 : index
    %c0_11 = arith.constant 0 : index
    %13 = vector.load %arg6[%c0_10, %c0_11] : memref<2x3xf32, #tpu.memory_space<vmem>>, vector<2x3xf32>
    tpu.vector_store %arg6[%c0_10, %c0_11], %12 {strides = array<i32>} : memref<2x3xf32, #tpu.memory_space<vmem>>, vector<2x3xf32>,
    %cst_12 = arith.constant dense<0xFF800000> : vector<2xf32>
    %14 = vector.multi_reduction <maximumf>, %12, %cst_12 [1] : vector<2x3xf32> to vector<2xf32>
    %15 = vector.shape_cast %14 : vector<2xf32> to vector<2x1xf32>
    %16 = vector.broadcast %15 : vector<2x1xf32> to vector<2x3xf32>
    %17 = arith.subf %12, %16 : vector<2x3xf32>
    %18 = math.exp %17 : vector<2x3xf32>
    %cst_13 = arith.constant dense<0.000000e+00> : vector<2xf32>
    %19 = vector.multi_reduction <add>, %18, %cst_13 [1] : vector<2x3xf32> to vector<2xf32>
    %20 = vector.shape_cast %19 : vector<2xf32> to vector<2x1xf32>
    %21 = math.log %20 : vector<2x1xf32>
    %22 = arith.addf %15, %21 : vector<2x1xf32>
    %c0_14 = arith.constant 0 : index
    %c0_15 = arith.constant 0 : index
    %23 = vector.load %arg5[%c0_14, %c0_15] : memref<2x3xf32, #tpu.memory_space<vmem>>, vector<2x3xf32>
    %24 = vector.broadcast %22 : vector<2x1xf32> to vector<2x3xf32>
    %25 = arith.subf %24, %12 : vector<2x3xf32>
    %26 = arith.mulf %23, %25 : vector<2x3xf32>
    %27 = vector.shape_cast %26 : vector<2x3xf32> to vector<1x2x3xf32>
    %cst_16 = arith.constant dense<0.000000e+00> : vector<1xf32>
    %28 = vector.multi_reduction <add>, %27, %cst_16 [1, 2] : vector<1x2x3xf32> to vector<1xf32>
    %29 = vector.shape_cast %28 : vector<1xf32> to vector<1x1x1xf32>
    %30 = vector.extract %29[0, 0, 0] : f32 from vector<1x1x1xf32>
    %31 = vector.broadcast %30 : f32 to vector<1x1xf32>
    %cst_17 = arith.constant 2.000000e+00 : f32
    %32 = vector.broadcast %cst_17 : f32 to vector<1x1xf32>
    %33 = arith.divf %31, %32 : vector<1x1xf32>
    %c0_18 = arith.constant 0 : index
    %c0_19 = arith.constant 0 : index
    %34 = vector.load %arg7[%c0_18, %c0_19] : memref<1x1xf32, #tpu.memory_space<vmem>>, vector<1x1xf32>
    tpu.vector_store %arg7[%c0_18, %c0_19], %33 {strides = array<i32>} : memref<1x1xf32, #tpu.memory_space<vmem>>, vector<1x1xf32>,
    return
  }
}

</mosaic_0001>

<bundles_post_ra>
// kernel: bert_forward.12
= control target key start
LH: loop header
LB: loop body
LE: loop exit
PB: predicated region body
PF: predicated region fallthrough
CT: control target
= control target key end

     0   :  { %s121_s0 = inlined_call_operand.vmem [shape: f32[16,128], index: 0, kind: input, shape index: {}]   ;;  %s122_s1 = inlined_call_operand.vmem [shape: f32[1,128], index: 1, kind: input, shape index: {}]   ;;  %s123_s2 = inlined_call_operand.vmem [shape: f32[1,128], index: 2, kind: input, shape index: {}]   ;;  %s124_s3 = inlined_call_operand.vmem [shape: bf16[16,128], index: 3, kind: output, shape index: {}]  }
   0x1   :  { %v14_v0 = vld [vmem:[%s121_s0] sm:$0xff]  ;;  %v15_v1 = vld [vmem:[%s121_s0 + $0x8] sm:$0xff] }
   0x2   :  { %16 = vadd.xlane.f32.xlu0 %v14_v0  ;;  %v71_v18 = vld [vmem:[%s122_s1] ss:$0 sm:$0xff] }
   0x3   :  { %v72_v22 = vld [vmem:[%s123_s2] ss:$0 sm:$0xff] }
   0x6   :  { %18 = vadd.xlane.f32.xlu0 %v15_v1 }
  0x8f   :  { %v17_v2 = vpop.xlane.xlu0 %16 }
  0x90   :  { %v21_v3 = vmul.f32 0.0078125, %v17_v2 }
  0x92   :  { %v23_v4 = vsub.f32 %v14_v0, %v21_v3 }
  0x93   :  { %v19_v5 = vpop.xlane.xlu0 %18 }
  0x94   :  { %v22_v6 = vmul.f32 0.0078125, %v19_v5  ;;  %v25_v7 = vmul.f32 %v23_v4, %v23_v4 }
  0x96   :  { %v24_v8 = vsub.f32 %v15_v1, %v22_v6  ;;  %27 = vadd.xlane.f32.xlu1 %v25_v7 }
  0x98   :  { %v26_v9 = vmul.f32 %v24_v8, %v24_v8 }
  0x9a   :  { %29 = vadd.xlane.f32.xlu1 %v26_v9 }
 0x123   :  { %v28_v10 = vpop.xlane.xlu1 %27 }
 0x124   :  { %v31_v11 = vmul.f32 0.0078125, %v28_v10 }
 0x126   :  { %v33_v12 = vadd.f32 1e-12, %v31_v11 }
 0x127   :  { %v30_v13 = vpop.xlane.xlu1 %29 }
 0x128   :  { %82 = vrsqrt.f32 %v33_v12  ;;  %v32_v14 = vmul.f32 0.0078125, %v30_v13 }
 0x12a   :  { %v34_v15 = vadd.f32 1e-12, %v32_v14 }
 0x12c   :  { %84 = vrsqrt.f32 %v34_v15 }
 0x132   :  { %v83_v16 = vpop.eup %82 }
 0x133   :  { %v37_v17 = vmul.f32 %v83_v16, %v23_v4 }
 0x135   :  { %v46_v20 = vmul.f32 %v71_v18, %v37_v17 }
 0x136   :  { %v85_v19 = vpop.eup %84 }
 0x137   :  { %v38_v21 = vmul.f32 %v85_v19, %v24_v8  ;;  %v55_v24 = vadd.f32 %v72_v22, %v46_v20 }
 0x139   :  { %v47_v23 = vmul.f32 %v71_v18, %v38_v21 }
 0x13b   :  { %v56_v25 = vadd.f32 %v72_v22, %v47_v23 }
 0x13d   :  { %v80_v26 = vpack.c.bf16 %v56_v25, %v55_v24 }
 0x13f   :  { %81 = vst [vmem:[%s124_s3] sm:$0xff] %v80_v26  }

// kernel: bert_forward.15
= control target key start
LH: loop header
LB: loop body
LE: loop exit
PB: predicated region body
PF: predicated region fallthrough
CT: control target
= control target key end

     0   :  { %v274_v0 = vmov 0.0   ;;  %vm275_vm0 = vmmov 0   ;;  %s353_s1 = inlined_call_operand.vmem [shape: bf16[128,128], index: 1, kind: input, shape index: {}]   ;;  %s354_s0 = inlined_call_operand.vmem [shape: bf16[16,128], index: 0, kind: input, shape index: {}]   ;;  %s355_s3 = inlined_call_operand.vmem [shape: bf16[16,128], index: 3, kind: input, shape index: {}]   ;;  %s356_s2 = inlined_call_operand.vmem [shape: f32[1,128], index: 2, kind: input, shape index: {}]   ;;  %s357_s4 = inlined_call_operand.vmem [shape: f32[1,128], index: 4, kind: input, shape index: {}]   ;;  %s358_s5 = inlined_call_operand.vmem [shape: f32[1,128], index: 5, kind: input, shape index: {}]   ;;  %s359_s6 = inlined_call_operand.vmem [shape: bf16[16,128], index: 6, kind: output, shape index: {}]  }
   0x1   :  { %239 = vmatprep.subr.bf16.mxu0 %v274_v0  ;;  %v261_v1 = vld [vmem:[%s353_s1] sm:$0xff]   ;;  %255 = vmatprep.mubr.msk.bf16.mxu0 %vm275_vm0, %v274_v0  ;;  %v262_v2 = vld [vmem:[%s353_s1 + $0x8] sm:$0xff]   ;;  %v263_v3 = vld [vmem:[%s353_s1 + $0x10] sm:$0xff]  }
   0x2   :  { %240 = vmatpush3.bf16.msra.mxu0 %v261_v1  ;;  %v264_v4 = vld [vmem:[%s353_s1 + $0x18] sm:$0xff]   ;;  %v265_v5 = vld [vmem:[%s353_s1 + $0x20] sm:$0xff]   ;;  %v266_v6 = vld [vmem:[%s353_s1 + $0x28] sm:$0xff]  }
   0x3   :  { %241 = vmatprep.subr.bf16.mxu0 %v274_v0  ;;  %v267_v7 = vld [vmem:[%s353_s1 + $0x30] sm:$0xff]   ;;  %v268_v8 = vld [vmem:[%s353_s1 + $0x38] sm:$0xff]   ;;  %v269_v9 = vld [vmem:[%s354_s0] sm:$0xff]  }
   0x4   :  { %v222_v10 = vld [vmem:[%s355_s3] sm:$0xff]  }
   0x5   :  { %v205_v11 = vld [vmem:[%s356_s2] ss:$0 sm:$0xff]  ;;  %v223_v12 = vunpack.c.l.bf16 %v222_v10  ;;  %v224_v20 = vunpack.c.h.bf16 %v222_v10 }
   0x6   :  { %242 = vmatpush3.bf16.msra.mxu0 %v262_v2  ;;  %v215_v38 = vld [vmem:[%s357_s4] ss:$0 sm:$0xff] }
   0x7   :  { %243 = vmatprep.subr.bf16.mxu0 %v274_v0  ;;  %v216_v42 = vld [vmem:[%s358_s5] ss:$0 sm:$0xff] }
   0xa   :  { %244 = vmatpush3.bf16.msra.mxu0 %v263_v3 }
   0xb   :  { %245 = vmatprep.subr.bf16.mxu0 %v274_v0 }
   0xe   :  { %246 = vmatpush3.bf16.msra.mxu0 %v264_v4 }
   0xf   :  { %247 = vmatprep.subr.bf16.mxu0 %v274_v0 }
  0x12   :  { %248 = vmatpush3.bf16.msra.mxu0 %v265_v5 }
  0x13   :  { %249 = vmatprep.subr.bf16.mxu0 %v274_v0 }
  0x16   :  { %250 = vmatpush3.bf16.msra.mxu0 %v266_v6 }
  0x17   :  { %251 = vmatprep.subr.bf16.mxu0 %v274_v0 }
  0x1a   :  { %252 = vmatpush3.bf16.msra.mxu0 %v267_v7 }
  0x1b   :  { %253 = vmatprep.subr.bf16.mxu0 %v274_v0 }
  0x1e   :  { %254 = vmatpush3.bf16.msra.mxu0 %v268_v8 }
  0x21   :  { %256 = vmatmul.mubr.bf16.vlgmr.msra.gmra.mrb[0].mxu0 %v269_v9 }
  0xf4   :  { %v137_v13 = vpop.f32.mrb[0].mxu0 }
  0xf5   :  { %v138_v14 = vadd.f32 %v205_v11, %v137_v13  ;;  %v257_v15 = vpop.f32.mrb[1].mxu0 }
  0xf6   :  { %v140_v16 = vpop.f32.mrb[2].mxu0 }
  0xf7   :  { %v141_v17 = vadd.f32 %v205_v11, %v140_v16  ;;  %v258_v18 = vpop.f32.mrb[3].mxu0  ;;  %v148_v19 = vadd.f32 %v223_v12, %v138_v14 }
  0xf9   :  { %150 = vadd.xlane.f32.xlu0 %v148_v19  ;;  %v149_v21 = vadd.f32 %v224_v20, %v141_v17 }
  0xfd   :  { %152 = vadd.xlane.f32.xlu0 %v149_v21 }
 0x186   :  { %v151_v22 = vpop.xlane.xlu0 %150 }
 0x187   :  { %v155_v23 = vmul.f32 0.0078125, %v151_v22 }
 0x189   :  { %v157_v24 = vsub.f32 %v148_v19, %v155_v23 }
 0x18a   :  { %v153_v25 = vpop.xlane.xlu0 %152 }
 0x18b   :  { %v156_v26 = vmul.f32 0.0078125, %v153_v25  ;;  %v159_v27 = vmul.f32 %v157_v24, %v157_v24 }
 0x18d   :  { %v158_v28 = vsub.f32 %v149_v21, %v156_v26  ;;  %161 = vadd.xlane.f32.xlu1 %v159_v27 }
 0x18f   :  { %v160_v29 = vmul.f32 %v158_v28, %v158_v28 }
 0x191   :  { %163 = vadd.xlane.f32.xlu1 %v160_v29 }
 0x21a   :  { %v162_v30 = vpop.xlane.xlu1 %161 }
 0x21b   :  { %v165_v31 = vmul.f32 0.0078125, %v162_v30 }
 0x21d   :  { %v167_v32 = vadd.f32 1e-12, %v165_v31 }
 0x21e   :  { %v164_v33 = vpop.xlane.xlu1 %163 }
 0x21f   :  { %270 = vrsqrt.f32 %v167_v32  ;;  %v166_v34 = vmul.f32 0.0078125, %v164_v33 }
 0x221   :  { %v168_v35 = vadd.f32 1e-12, %v166_v34 }
 0x223   :  { %272 = vrsqrt.f32 %v168_v35 }
 0x229   :  { %v271_v36 = vpop.eup %270 }
 0x22a   :  { %v171_v37 = vmul.f32 %v271_v36, %v157_v24 }
 0x22c   :  { %v180_v40 = vmul.f32 %v215_v38, %v171_v37 }
 0x22d   :  { %v273_v39 = vpop.eup %272 }
 0x22e   :  { %v172_v41 = vmul.f32 %v273_v39, %v158_v28  ;;  %v189_v44 = vadd.f32 %v216_v42, %v180_v40 }
 0x230   :  { %v181_v43 = vmul.f32 %v215_v38, %v172_v41 }
 0x232   :  { %v190_v45 = vadd.f32 %v216_v42, %v181_v43 }
 0x234   :  { %v228_v46 = vpack.c.bf16 %v190_v45, %v189_v44 }
 0x236   :  { %229 = vst [vmem:[%s359_s6] sm:$0xff] %v228_v46  }

// kernel: bert_forward.14
= control target key start
LH: loop header
LB: loop body
LE: loop exit
PB: predicated region body
PF: predicated region fallthrough
CT: control target
= control target key end

     0   :  { %s845_s15 = smov 0   ;;  %s847_s16 = smov 0   ;;  %s925_s0 = inlined_call_operand.vmem [shape: bf16[2,8,384], index: 0, kind: input, shape index: {}, may-alias: {0,1,2}]   ;;  %s926_s1 = inlined_call_operand.vmem [shape: bf16[2,8,384], index: 1, kind: input, shape index: {}, may-alias: {0,1,2}]   ;;  %s927_s2 = inlined_call_operand.vmem [shape: bf16[2,8,384], index: 2, kind: input, shape index: {}, may-alias: {0,1,2}]   ;;  %s928_s3 = inlined_call_operand.vmem [shape: f32[2,1,8], index: 3, kind: input, shape index: {}]   ;;  %s929_s4 = inlined_call_operand.vmem [shape: bf16[2,8,128], index: 4, kind: output, shape index: {}]  }
   0x1   :  { %s849_s17 = smov 0  }
   0x2 LB: > { %s26_s18 = sadd.s32 1, %s811_s16  ;;  %p699_p0 = scmp.ge.s32.totalorder %s815_s17, 1  ;;  %s815_s17 = sphi %s849_s17, %s14_s17   ;;  %s811_s16 = sphi %s847_s16, %s931_s16   ;;  %s807_s15 = sphi %s845_s15, %s930_s15  }
   0x3   : > { %p28_p1 = scmp.ge.s32.totalorder %s26_s18, 2  ;;  %p227_p2 = scmp.lt.s32.totalorder %s815_s17, 3 }
   0x5   : > { %s933_s18 = smov (%p28_p1, %s26_s18), 0  ;;  %p228_p3 = pnand %p699_p0, %p227_p2 }
   0x6   : > { %p279_p4 = scmp.lt.s32.totalorder (!%p228_p3), %s807_s15, 1  ;;  %v817_v0 = vmov (!%p228_p3), 0.0   ;;  %vm818_vm0 = vmmov (!%p228_p3), 0   ;;  %vm322_vm1 = vcmask (!%p228_p3), 523264   ;;  %vm377_vm2 = vcmask (!%p228_p3), 64512   ;;  %s819_s30 = smov (!%p228_p3), 64  }
   0x7   : > { %231 = sbr.rel (%p228_p3) target bundleno = 1430 (0x596), region = 36  ;;  %728 = vmatprep.subr.bf16.mxu0 (!%p228_p3), %v817_v0  ;;  %730 = vmatprep.mubr.msk.bf16.mxu0 (!%p228_p3), %vm818_vm0, %v817_v0  ;;  %vm393_vm3 = vcmask (!%p228_p3), 1043456   ;;  %vm438_vm4 = vcmask (!%p228_p3), 519168   ;;  %vm571_vm5 = vcmask (!%p228_p3), 1043968  }
   0x8   : > { %734 = vmatprep.subr.bf16.mxu1 (!%p228_p3), %v817_v0  ;;  %736 = vmatprep.mubr.msk.bf16.mxu1 (!%p228_p3), %vm818_vm0, %v817_v0 }
   0xe   : > { %s935_s15 = smov (!%p279_p4, %s807_s15), 1 }
   0xf   : > { %s868_s19 = smul.u32 12, %s935_s15  ;;  %s309_s29 = scalar_lea.vmem %s928_s3, %s935_s15 }
  0x10   : > { %v705_v5 = vld [vmem:[%s309_s29] ss:$0 sm:$0xff]  ;;  %s703_s9 = sshll.u32 %s935_s15, 2 }
  0x11   : > { %s716_s20 = sadd.s32 4, %s868_s19  ;;  %s286_s23 = scalar_lea.vmem %s925_s0, %s868_s19 }
  0x12   : > { %s295_s26 = scalar_lea.vmem %s926_s1, %s716_s20  ;;  %v319_v3 = vld [vmem:[%s286_s23] sm:$0xf]  ;;  %s718_s5 = sadd.s32 8, %s868_s19 }
  0x13   : > { %v320_v1 = vld [vmem:[%s295_s26] sm:$0xf]  ;;  %s893_s8 = scalar_lea.vmem %s927_s2, %s718_s5  ;;  %s905_s12 = scalar_lea.vmem %s929_s4, %s703_s9 }
  0x14   : > { %v327_v2 = vsel %vm322_vm1, %v320_v1, 0  ;;  %v782_v12 = vld [vmem:[%s295_s26] ss:$0 sps:$4 sm:$0xff]  }
  0x15   : > { %729 = vmatpush3.bf16.xpose.msra.mxu0 %v327_v2  ;;  %451 = vrot.lane.b32.xlu1 %v782_v12, %s819_s30  ;;  %v783_v13 = vld [vmem:[%s286_s23] ss:$0 sps:$4 sm:$0xff]  }
  0x16   : > { %746 = vmatprep.subr.bf16.mxu0 %v817_v0  ;;  %v321_v19 = vld [vmem:[%s893_s8] sm:$0xf] }
  0x17   : > { %v395_v20 = vsel %vm393_vm3, %v321_v19, 0  ;;  %v784_v40 = vld [vmem:[%s893_s8] ss:$0 sps:$4 sm:$0xff]  }
  0x18   : > { %735 = vmatpush3.bf16.msra.mxu1 %v395_v20 }
  0x19   : > { %446 = vrot.lane.b32.xlu1 %v783_v13, %s819_s30  ;;  %740 = vmatprep.subr.bf16.mxu1 %v817_v0 }
  0x1c   : > { %731 = vmatmul.mubr.msk.bf16.vlgmr.msra.gmra.mrb[0].mxu0 %vm322_vm1, %v319_v3 }
  0x1d   : > { %748 = vmatprep.mubr.msk.bf16.mxu0 %vm818_vm0, %v817_v0 }
  0x87   : > { %v452_v23 = vpop.permute.xlu1 %451 }
  0x88   : > { %v457_v25 = vsel %vm322_vm1, %v452_v23, 0 }
  0x8b   : > { %v447_v27 = vpop.permute.xlu1 %446 }
  0xef   : > { %v363_v4 = vpop.f32.mrb[0].mxu0 }
  0xf0   : > { %v369_v6 = vmul.f32 0.125, %v363_v4  ;;  %v732_v7 = vpop.f32.mrb[1].mxu0 }
  0xf1   : > { %v366_v8 = vpop.f32.mrb[2].mxu0 }
  0xf2   : > { %v733_v9 = vpop.f32.mrb[3].mxu0  ;;  %v376_v10 = vadd.f32 %v705_v5, %v369_v6 }
  0xf4   : > { %v378_v11 = vsel %vm377_vm2, %v376_v10, -inf }
  0xf5   : > { %379 = vmax.xlane.f32.xlu0 %v378_v11 }
 0x182   : > { %v380_v14 = vpop.xlane.xlu0 %379 }
 0x183   : > { %v381_v15 = vsub.f32 %v376_v10, %v380_v14 }
 0x185   : > { %v382_v16 = vmul.f32 1.442695, %v381_v15 }
 0x187   : > { %785 = vpow2.f32 %v382_v16 }
 0x191   : > { %v786_v17 = vpop.eup %785 }
 0x192   : > { %v384_v18 = vsel %vm377_vm2, %v786_v17, 0.0 }
 0x193   : > { %385 = vadd.xlane.f32.xlu0 %v384_v18 }
 0x220   : > { %v386_v21 = vpop.xlane.xlu0 %385 }
 0x221   : > { %787 = vrcp.f32 %v386_v21 }
 0x22b   : > { %v788_v22 = vpop.eup %787 }
 0x22c   : > { %v388_v24 = vmul.f32 %v788_v22, %v786_v17 }
 0x22e   : > { %v389_v26 = vpack.c.bf16 %v388_v24, %v388_v24 }
 0x230   : > { %737 = vmatmul.mubr.msk.bf16.vlgmr.msra.gmra.mrb[0].mxu1 %vm377_vm2, %v389_v26 }
 0x231   : > { %741 = vmatpush3.bf16.xpose.msra.mxu1 %v457_v25  ;;  %742 = vmatprep.mubr.msk.bf16.mxu1 %vm818_vm0, %v817_v0 }
 0x238   : > { %743 = vmatmul.mubr.msk.bf16.vlgmr.msra.gmra.mrb[4].mxu1 %vm322_vm1, %v447_v27 }
 0x303   : > { %v431_v28 = vpop.f32.mrb[0].mxu1 }
 0x304   : > { %v437_v29 = vpack.c.bf16 %v431_v28, %v431_v28  ;;  %v738_v30 = vpop.f32.mrb[1].mxu1 }
 0x305   : > { %v434_v31 = vpop.f32.mrb[2].mxu1 }
 0x306   : > { %439 = vst.msk [vmem:[%s905_s12] sm:$0xf] %vm438_vm4, %v437_v29  ;;  %v739_v32 = vpop.f32.mrb[3].mxu1 }
 0x30b   : > { %v493_v33 = vpop.f32.mrb[4].mxu1 }
 0x30c   : > { %v499_v34 = vmul.f32 0.125, %v493_v33  ;;  %v744_v35 = vpop.f32.mrb[5].mxu1 }
 0x30d   : > { %v496_v36 = vpop.f32.mrb[6].mxu1 }
 0x30e   : > { %v745_v37 = vpop.f32.mrb[7].mxu1  ;;  %v500_v38 = vadd.f32 %v705_v5, %v499_v34 }
 0x310   : > { %v501_v39 = vsel %vm377_vm2, %v500_v38, -inf }
 0x311   : > { %502 = vmax.xlane.f32.xlu0 %v501_v39 }
 0x327   : > { %516 = vrot.lane.b32.xlu0 %v784_v40, %s819_s30 }
 0x39e   : > { %v503_v41 = vpop.xlane.xlu0 %502 }
 0x39f   : > { %v504_v42 = vsub.f32 %v500_v38, %v503_v41 }
 0x3a1   : > { %v505_v43 = vmul.f32 1.442695, %v504_v42 }
 0x3a2   : > { %v517_v46 = vpop.permute.xlu0 %516 }
 0x3a3   : > { %789 = vpow2.f32 %v505_v43  ;;  %v522_v47 = vsel %vm393_vm3, %v517_v46, 0 }
 0x3a4   : > { %747 = vmatpush3.bf16.msra.mxu0 %v522_v47 }
 0x3ad   : > { %v790_v44 = vpop.eup %789 }
 0x3ae   : > { %v507_v45 = vsel %vm377_vm2, %v790_v44, 0.0 }
 0x3af   : > { %508 = vadd.xlane.f32.xlu1 %v507_v45 }
 0x43c   : > { %v509_v48 = vpop.xlane.xlu1 %508 }
 0x43d   : > { %791 = vrcp.f32 %v509_v48 }
 0x447   : > { %v792_v49 = vpop.eup %791 }
 0x448   : > { %v511_v50 = vmul.f32 %v792_v49, %v790_v44 }
 0x44a   : > { %v512_v51 = vpack.c.bf16 %v511_v50, %v511_v50 }
 0x44c   : > { %749 = vmatmul.mubr.msk.bf16.vlgmr.msra.gmra.mrb[4].mxu0 %vm377_vm2, %v512_v51 }
 0x51f   : > { %v558_v52 = vpop.f32.mrb[4].mxu0 }
 0x520   : > { %v719_v53 = vpack.c.bf16 %v558_v52, %v558_v52  ;;  %v750_v54 = vpop.f32.mrb[5].mxu0 }
 0x521   : > { %v561_v55 = vpop.f32.mrb[6].mxu0 }
 0x522   : > { %568 = vrot.lane.b32.xlu0 %v719_v53, %s819_s30  ;;  %v751_v56 = vpop.f32.mrb[7].mxu0 }
 0x594   : > { %v569_v57 = vpop.permute.xlu0 %568 }
 0x595   : > { %572 = vst.msk [vmem:[%s905_s12] sm:$0xf] %vm571_vm5, %v569_v57 }
 0x596 PF: > { %s14_s17 = sadd.s32 1, %s815_s17   ;;  %s930_s15 = smov %s811_s16 }
 0x597   : > { %p11_p5 = scmp.ge.s32.totalorder %s14_s17, 4   ;;  %s931_s16 = smov %s933_s18 }
 0x599   :  { %13 = sbr.rel (!%p11_p5) target bundleno = 2 (0x2), region = 75 }

// kernel: bert_forward.13
= control target key start
LH: loop header
LB: loop body
LE: loop exit
PB: predicated region body
PF: predicated region fallthrough
CT: control target
= control target key end

     0   :  { %v410_v0 = vmov 0.0   ;;  %vm411_vm0 = vmmov 0   ;;  %v412_v3 = vmov 0   ;;  %v51_v27 = vlaneseq  ;;  %s523_s1 = inlined_call_operand.vmem [shape: bf16[128,384], index: 1, kind: input, shape index: {}]   ;;  %s524_s0 = inlined_call_operand.vmem [shape: bf16[16,128], index: 0, kind: input, shape index: {}]   ;;  %s525_s2 = inlined_call_operand.vmem [shape: f32[1,384], index: 2, kind: input, shape index: {}]   ;;  %s526_s3 = inlined_call_operand.vmem [shape: bf16[16,384], index: 3, kind: output, shape index: {}]  }
   0x1   :  { %354 = vmatprep.subr.bf16.mxu1 %v410_v0  ;;  %v377_v1 = vld [vmem:[%s523_s1 + $0x4] ss:$12 sps:$4 sm:$0xff]   ;;  %370 = vmatprep.mubr.msk.bf16.mxu1 %vm411_vm0, %v410_v0  ;;  %v379_v2 = vld [vmem:[%s523_s1 + $0x8] ss:$12 sps:$4 sm:$0xff]   ;;  %v380_v4 = vld [vmem:[%s523_s1] ss:$12 sps:$4 sm:$0xff]  }
   0x2   :  { %232 = vmatprep.mubr.bf16.mxu0 %v412_v3  ;;  %200 = vmatprep.subr.bf16.mxu0 %v377_v1  ;;  %v381_v5 = vld [vmem:[%s523_s1 + $0x1c] ss:$12 sps:$4 sm:$0xff]   ;;  %v383_v6 = vld [vmem:[%s523_s1 + $0x20] ss:$12 sps:$4 sm:$0xff]   ;;  %v384_v7 = vld [vmem:[%s523_s1 + $0x18] ss:$12 sps:$4 sm:$0xff]  }
   0x3   :  { %355 = vmatpush3.bf16.msra.mxu1 %v379_v2  ;;  %201 = vmatpush1.bf16.msra.mxu0 %v380_v4  ;;  %v385_v8 = vld [vmem:[%s523_s1 + $0x34] ss:$12 sps:$4 sm:$0xff]   ;;  %v387_v9 = vld [vmem:[%s523_s1 + $0x38] ss:$12 sps:$4 sm:$0xff]   ;;  %v388_v10 = vld [vmem:[%s523_s1 + $0x30] ss:$12 sps:$4 sm:$0xff]  }
   0x4   :  { %356 = vmatprep.subr.bf16.mxu1 %v410_v0  ;;  %202 = vmatprep.subr.bf16.mxu0 %v381_v5  ;;  %v389_v11 = vld [vmem:[%s523_s1 + $0x4c] ss:$12 sps:$4 sm:$0xff]   ;;  %v391_v12 = vld [vmem:[%s523_s1 + $0x50] ss:$12 sps:$4 sm:$0xff]   ;;  %v392_v13 = vld [vmem:[%s523_s1 + $0x48] ss:$12 sps:$4 sm:$0xff]  }
   0x5   :  { %v393_v14 = vld [vmem:[%s523_s1 + $0x64] ss:$12 sps:$4 sm:$0xff]   ;;  %v395_v15 = vld [vmem:[%s523_s1 + $0x68] ss:$12 sps:$4 sm:$0xff]   ;;  %v396_v16 = vld [vmem:[%s523_s1 + $0x60] ss:$12 sps:$4 sm:$0xff]  }
   0x6   :  { %v397_v17 = vld [vmem:[%s523_s1 + $0x7c] ss:$12 sps:$4 sm:$0xff]   ;;  %v399_v18 = vld [vmem:[%s523_s1 + $0x80] ss:$12 sps:$4 sm:$0xff]   ;;  %v400_v19 = vld [vmem:[%s523_s1 + $0x78] ss:$12 sps:$4 sm:$0xff]  }
   0x7   :  { %357 = vmatpush3.bf16.msra.mxu1 %v383_v6  ;;  %203 = vmatpush1.bf16.msra.mxu0 %v384_v7  ;;  %v401_v20 = vld [vmem:[%s523_s1 + $0x94] ss:$12 sps:$4 sm:$0xff]   ;;  %v403_v21 = vld [vmem:[%s523_s1 + $0x98] ss:$12 sps:$4 sm:$0xff]   ;;  %v404_v22 = vld [vmem:[%s523_s1 + $0x90] ss:$12 sps:$4 sm:$0xff]  }
   0x8   :  { %358 = vmatprep.subr.bf16.mxu1 %v410_v0  ;;  %204 = vmatprep.subr.bf16.mxu0 %v385_v8  ;;  %v405_v23 = vld [vmem:[%s523_s1 + $0xac] ss:$12 sps:$4 sm:$0xff]   ;;  %v407_v24 = vld [vmem:[%s523_s1 + $0xb0] ss:$12 sps:$4 sm:$0xff]   ;;  %v408_v25 = vld [vmem:[%s523_s1 + $0xa8] ss:$12 sps:$4 sm:$0xff]  }
   0x9   :  { %v409_v26 = vld [vmem:[%s524_s0] sm:$0xff]   ;;  %v52_v28 = vshrl.u32 %v51_v27, 7 }
   0xa   :  { %v49_v30 = vld [vmem:[%s525_s2] sm:$0x7] }
   0xb   :  { %359 = vmatpush3.bf16.msra.mxu1 %v387_v9  ;;  %205 = vmatpush1.bf16.msra.mxu0 %v388_v10  ;;  %v61_v29 = vsub.s32 2, %v52_v28  ;;  %v53_v31 = vsub.s32 0, %v52_v28  ;;  %v57_v32 = vsub.s32 1, %v52_v28 }
   0xc   :  { %360 = vmatprep.subr.bf16.mxu1 %v410_v0  ;;  %206 = vmatprep.subr.bf16.mxu0 %v389_v11 }
   0xd   :  { %v62_v33 = vrot.slane %v49_v30, %v61_v29  ;;  %v54_v34 = vrot.slane %v49_v30, %v53_v31  ;;  %v58_v35 = vrot.slane %v49_v30, %v57_v32 }
   0xf   :  { %361 = vmatpush3.bf16.msra.mxu1 %v391_v12  ;;  %207 = vmatpush1.bf16.msra.mxu0 %v392_v13 }
  0x10   :  { %362 = vmatprep.subr.bf16.mxu1 %v410_v0  ;;  %208 = vmatprep.subr.bf16.mxu0 %v393_v14 }
  0x13   :  { %363 = vmatpush3.bf16.msra.mxu1 %v395_v15  ;;  %209 = vmatpush1.bf16.msra.mxu0 %v396_v16 }
  0x14   :  { %364 = vmatprep.subr.bf16.mxu1 %v410_v0  ;;  %210 = vmatprep.subr.bf16.mxu0 %v397_v17 }
  0x17   :  { %365 = vmatpush3.bf16.msra.mxu1 %v399_v18  ;;  %211 = vmatpush1.bf16.msra.mxu0 %v400_v19 }
  0x18   :  { %366 = vmatprep.subr.bf16.mxu1 %v410_v0  ;;  %212 = vmatprep.subr.bf16.mxu0 %v401_v20 }
  0x1b   :  { %367 = vmatpush3.bf16.msra.mxu1 %v403_v21  ;;  %213 = vmatpush1.bf16.msra.mxu0 %v404_v22 }
  0x1c   :  { %368 = vmatprep.subr.bf16.mxu1 %v410_v0  ;;  %214 = vmatprep.subr.bf16.mxu0 %v405_v23 }
  0x1f   :  { %369 = vmatpush3.bf16.msra.mxu1 %v407_v24  ;;  %215 = vmatpush1.bf16.msra.mxu0 %v408_v25 }
  0x22   :  { %371 = vmatmul.mubr.bf16.vlgmr.msra.gmra.mrb[0].mxu1 %v409_v26  ;;  %233 = vmatmul.mubr.bf16.vlgmr.msra.gmra.mrb[0].mxu0 %v409_v26 }
  0xf5   :  { %v277_v36 = vpop.f32.mrb[0].mxu1  ;;  %v234_v38 = vpop.f32.mrb[0].mxu0 }
  0xf6   :  { %v278_v37 = vadd.f32 %v277_v36, %v62_v33  ;;  %v372_v39 = vpop.f32.mrb[1].mxu1  ;;  %v235_v40 = vadd.f32 %v234_v38, %v54_v34  ;;  %v236_v41 = vpop.f32.mrb[1].mxu0 }
  0xf7   :  { %v280_v42 = vpop.f32.mrb[2].mxu1  ;;  %v237_v44 = vadd.f32 %v236_v41, %v58_v35  ;;  %v238_v46 = vpop.f32.mrb[2].mxu0 }
  0xf8   :  { %v342_v43 = vpack.c.bf16 %v278_v37, %v278_v37  ;;  %v281_v45 = vadd.f32 %v280_v42, %v62_v33  ;;  %v373_v47 = vpop.f32.mrb[3].mxu1  ;;  %v239_v48 = vadd.f32 %v238_v46, %v54_v34  ;;  %v240_v49 = vpop.f32.mrb[3].mxu0 }
  0xf9   :  { %v341_v50 = vpack.c.bf16 %v237_v44, %v235_v40  ;;  %v241_v52 = vadd.f32 %v240_v49, %v58_v35 }
  0xfa   :  { %305 = vst [vmem:[%s526_s3 + $0x8] sm:$0xf] %v342_v43  ;;  %v344_v51 = vpack.c.bf16 %v281_v45, %v281_v45 }
  0xfb   :  { %304 = vst [vmem:[%s526_s3] sm:$0xff] %v341_v50  ;;  %v343_v53 = vpack.c.bf16 %v241_v52, %v239_v48 }
  0xfc   :  { %307 = vst [vmem:[%s526_s3 + $0x14] sm:$0xf] %v344_v51 }
  0xfd   :  { %306 = vst [vmem:[%s526_s3 + $0xc] sm:$0xff] %v343_v53 }

// kernel: bert_forward.16
= control target key start
LH: loop header
LB: loop body
LE: loop exit
PB: predicated region body
PF: predicated region fallthrough
CT: control target
= control target key end

     0   :  { %v502_v1 = vmov 0   ;;  %v51_v34 = vlaneseq  ;;  %s637_s1 = inlined_call_operand.vmem [shape: bf16[128,512], index: 1, kind: input, shape index: {}]   ;;  %s638_s0 = inlined_call_operand.vmem [shape: bf16[16,128], index: 0, kind: input, shape index: {}]   ;;  %s639_s2 = inlined_call_operand.vmem [shape: f32[1,512], index: 2, kind: input, shape index: {}]   ;;  %s640_s3 = inlined_call_operand.vmem [shape: bf16[16,512], index: 3, kind: output, shape index: {}]  }
   0x1   :  { %v437_v0 = vld [vmem:[%s637_s1 + $0x4] ss:$16 sps:$4 sm:$0xff]   ;;  %269 = vmatprep.mubr.bf16.mxu0 %v502_v1  ;;  %312 = vmatprep.mubr.bf16.mxu1 %v502_v1  ;;  %v439_v2 = vld [vmem:[%s637_s1 + $0xc] ss:$16 sps:$4 sm:$0xff]   ;;  %v441_v3 = vld [vmem:[%s637_s1] ss:$16 sps:$4 sm:$0xff]  }
   0x2   :  { %237 = vmatprep.subr.bf16.mxu0 %v437_v0  ;;  %v442_v4 = vld [vmem:[%s637_s1 + $0x8] ss:$16 sps:$4 sm:$0xff]   ;;  %280 = vmatprep.subr.bf16.mxu1 %v439_v2  ;;  %v443_v5 = vld [vmem:[%s637_s1 + $0x24] ss:$16 sps:$4 sm:$0xff]   ;;  %v445_v6 = vld [vmem:[%s637_s1 + $0x2c] ss:$16 sps:$4 sm:$0xff]  }
   0x3   :  { %238 = vmatpush1.bf16.msra.mxu0 %v441_v3  ;;  %281 = vmatpush1.bf16.msra.mxu1 %v442_v4  ;;  %v447_v7 = vld [vmem:[%s637_s1 + $0x20] ss:$16 sps:$4 sm:$0xff]   ;;  %v448_v8 = vld [vmem:[%s637_s1 + $0x28] ss:$16 sps:$4 sm:$0xff]   ;;  %v449_v9 = vld [vmem:[%s637_s1 + $0x44] ss:$16 sps:$4 sm:$0xff]  }
   0x4   :  { %239 = vmatprep.subr.bf16.mxu0 %v443_v5  ;;  %282 = vmatprep.subr.bf16.mxu1 %v445_v6  ;;  %v451_v10 = vld [vmem:[%s637_s1 + $0x4c] ss:$16 sps:$4 sm:$0xff]   ;;  %v453_v11 = vld [vmem:[%s637_s1 + $0x40] ss:$16 sps:$4 sm:$0xff]   ;;  %v454_v12 = vld [vmem:[%s637_s1 + $0x48] ss:$16 sps:$4 sm:$0xff]  }
   0x5   :  { %v455_v13 = vld [vmem:[%s637_s1 + $0x64] ss:$16 sps:$4 sm:$0xff]   ;;  %v457_v14 = vld [vmem:[%s637_s1 + $0x6c] ss:$16 sps:$4 sm:$0xff]   ;;  %v459_v15 = vld [vmem:[%s637_s1 + $0x60] ss:$16 sps:$4 sm:$0xff]  }
   0x6   :  { %v460_v16 = vld [vmem:[%s637_s1 + $0x68] ss:$16 sps:$4 sm:$0xff]   ;;  %v461_v17 = vld [vmem:[%s637_s1 + $0x84] ss:$16 sps:$4 sm:$0xff]   ;;  %v463_v18 = vld [vmem:[%s637_s1 + $0x8c] ss:$16 sps:$4 sm:$0xff]  }
   0x7   :  { %240 = vmatpush1.bf16.msra.mxu0 %v447_v7  ;;  %283 = vmatpush1.bf16.msra.mxu1 %v448_v8  ;;  %v465_v19 = vld [vmem:[%s637_s1 + $0x80] ss:$16 sps:$4 sm:$0xff]   ;;  %v466_v20 = vld [vmem:[%s637_s1 + $0x88] ss:$16 sps:$4 sm:$0xff]   ;;  %v467_v21 = vld [vmem:[%s637_s1 + $0xa4] ss:$16 sps:$4 sm:$0xff]  }
   0x8   :  { %241 = vmatprep.subr.bf16.mxu0 %v449_v9  ;;  %284 = vmatprep.subr.bf16.mxu1 %v451_v10  ;;  %v469_v22 = vld [vmem:[%s637_s1 + $0xac] ss:$16 sps:$4 sm:$0xff]   ;;  %v471_v23 = vld [vmem:[%s637_s1 + $0xa0] ss:$16 sps:$4 sm:$0xff]   ;;  %v472_v24 = vld [vmem:[%s637_s1 + $0xa8] ss:$16 sps:$4 sm:$0xff]  }
   0x9   :  { %v473_v25 = vld [vmem:[%s637_s1 + $0xc4] ss:$16 sps:$4 sm:$0xff]   ;;  %v475_v26 = vld [vmem:[%s637_s1 + $0xcc] ss:$16 sps:$4 sm:$0xff]   ;;  %v477_v27 = vld [vmem:[%s637_s1 + $0xc0] ss:$16 sps:$4 sm:$0xff]  }
   0xa   :  { %v478_v28 = vld [vmem:[%s637_s1 + $0xc8] ss:$16 sps:$4 sm:$0xff]   ;;  %v479_v29 = vld [vmem:[%s637_s1 + $0xe4] ss:$16 sps:$4 sm:$0xff]   ;;  %v481_v30 = vld [vmem:[%s637_s1 + $0xec] ss:$16 sps:$4 sm:$0xff]  }
   0xb   :  { %242 = vmatpush1.bf16.msra.mxu0 %v453_v11  ;;  %285 = vmatpush1.bf16.msra.mxu1 %v454_v12  ;;  %v483_v31 = vld [vmem:[%s637_s1 + $0xe0] ss:$16 sps:$4 sm:$0xff]   ;;  %v484_v32 = vld [vmem:[%s637_s1 + $0xe8] ss:$16 sps:$4 sm:$0xff]   ;;  %v52_v35 = vshrl.u32 %v51_v34, 7 }
   0xc   :  { %243 = vmatprep.subr.bf16.mxu0 %v455_v13  ;;  %286 = vmatprep.subr.bf16.mxu1 %v457_v14  ;;  %v485_v33 = vld [vmem:[%s638_s0] sm:$0xff]  }
   0xd   :  { %v53_v36 = vsub.s32 0, %v52_v35  ;;  %v61_v37 = vsub.s32 2, %v52_v35  ;;  %v49_v38 = vld [vmem:[%s639_s2] sm:$0xf]  ;;  %v57_v39 = vsub.s32 1, %v52_v35  ;;  %v65_v40 = vsub.s32 3, %v52_v35 }
   0xf   :  { %244 = vmatpush1.bf16.msra.mxu0 %v459_v15  ;;  %287 = vmatpush1.bf16.msra.mxu1 %v460_v16  ;;  %v54_v41 = vrot.slane %v49_v38, %v53_v36  ;;  %v62_v42 = vrot.slane %v49_v38, %v61_v37  ;;  %v58_v43 = vrot.slane %v49_v38, %v57_v39 }
  0x10   :  { %245 = vmatprep.subr.bf16.mxu0 %v461_v17  ;;  %288 = vmatprep.subr.bf16.mxu1 %v463_v18  ;;  %v66_v44 = vrot.slane %v49_v38, %v65_v40 }
  0x13   :  { %246 = vmatpush1.bf16.msra.mxu0 %v465_v19  ;;  %289 = vmatpush1.bf16.msra.mxu1 %v466_v20 }
  0x14   :  { %247 = vmatprep.subr.bf16.mxu0 %v467_v21  ;;  %290 = vmatprep.subr.bf16.mxu1 %v469_v22 }
  0x17   :  { %248 = vmatpush1.bf16.msra.mxu0 %v471_v23  ;;  %291 = vmatpush1.bf16.msra.mxu1 %v472_v24 }
  0x18   :  { %249 = vmatprep.subr.bf16.mxu0 %v473_v25  ;;  %292 = vmatprep.subr.bf16.mxu1 %v475_v26 }
  0x1b   :  { %250 = vmatpush1.bf16.msra.mxu0 %v477_v27  ;;  %293 = vmatpush1.bf16.msra.mxu1 %v478_v28 }
  0x1c   :  { %251 = vmatprep.subr.bf16.mxu0 %v479_v29  ;;  %294 = vmatprep.subr.bf16.mxu1 %v481_v30 }
  0x1f   :  { %252 = vmatpush1.bf16.msra.mxu0 %v483_v31  ;;  %295 = vmatpush1.bf16.msra.mxu1 %v484_v32 }
  0x22   :  { %270 = vmatmul.mubr.bf16.vlgmr.msra.gmra.mrb[0].mxu0 %v485_v33  ;;  %313 = vmatmul.mubr.bf16.vlgmr.msra.gmra.mrb[0].mxu1 %v485_v33 }
  0xf5   :  { %v271_v45 = vpop.f32.mrb[0].mxu0  ;;  %v314_v46 = vpop.f32.mrb[0].mxu1 }
  0xf6   :  { %v272_v47 = vadd.f32 %v271_v45, %v54_v41  ;;  %v315_v48 = vadd.f32 %v314_v46, %v62_v42  ;;  %v273_v49 = vpop.f32.mrb[1].mxu0  ;;  %v316_v50 = vpop.f32.mrb[1].mxu1 }
  0xf7   :  { %v274_v51 = vadd.f32 %v273_v49, %v58_v43  ;;  %v317_v52 = vadd.f32 %v316_v50, %v66_v44  ;;  %v275_v53 = vpop.f32.mrb[2].mxu0  ;;  %v318_v54 = vpop.f32.mrb[2].mxu1 }
  0xf8   :  { %v331_v55 = vmul.f32 0.70710677, %v272_v47  ;;  %v333_v56 = vmul.f32 0.70710677, %v315_v48  ;;  %v276_v59 = vadd.f32 %v275_v53, %v54_v41  ;;  %v319_v60 = vadd.f32 %v318_v54, %v62_v42  ;;  %v277_v61 = vpop.f32.mrb[3].mxu0  ;;  %v320_v62 = vpop.f32.mrb[3].mxu1 }
  0xf9   :  { %v332_v57 = vmul.f32 0.70710677, %v274_v51  ;;  %v334_v58 = vmul.f32 0.70710677, %v317_v52  ;;  %v278_v63 = vadd.f32 %v277_v61, %v58_v43  ;;  %v321_v0 = vadd.f32 %v320_v62, %v66_v44 }
  0xfa   :  { %486 = verf.f32 %v331_v55  ;;  %v335_v1 = vmul.f32 0.70710677, %v276_v59  ;;  %v337_v2 = vmul.f32 0.70710677, %v319_v60  ;;  %v323_v7 = vmul.f32 0.5, %v272_v47 }
  0xfb   :  { %488 = verf.f32 %v333_v56  ;;  %v336_v3 = vmul.f32 0.70710677, %v278_v63  ;;  %v338_v4 = vmul.f32 0.70710677, %v321_v0  ;;  %v325_v10 = vmul.f32 0.5, %v315_v48 }
  0xfc   :  { %490 = verf.f32 %v332_v57  ;;  %v324_v14 = vmul.f32 0.5, %v274_v51  ;;  %v326_v18 = vmul.f32 0.5, %v317_v52  ;;  %v327_v22 = vmul.f32 0.5, %v276_v59 }
  0xfd   :  { %492 = verf.f32 %v334_v58  ;;  %v329_v26 = vmul.f32 0.5, %v319_v60  ;;  %v328_v31 = vmul.f32 0.5, %v278_v63  ;;  %v330_v35 = vmul.f32 0.5, %v321_v0 }
  0xfe   :  { %494 = verf.f32 %v335_v1 }
  0xff   :  { %496 = verf.f32 %v337_v2 }
 0x100   :  { %498 = verf.f32 %v336_v3 }
 0x101   :  { %500 = verf.f32 %v338_v4 }
 0x104   :  { %v487_v5 = vpop.eup %486 }
 0x105   :  { %v489_v6 = vpop.eup %488  ;;  %v347_v8 = vadd.f32 1.0, %v487_v5 }
 0x106   :  { %v491_v9 = vpop.eup %490  ;;  %v349_v11 = vadd.f32 1.0, %v489_v6 }
 0x107   :  { %v493_v12 = vpop.eup %492  ;;  %v355_v13 = vmul.f32 %v347_v8, %v323_v7  ;;  %v348_v15 = vadd.f32 1.0, %v491_v9 }
 0x108   :  { %v495_v16 = vpop.eup %494  ;;  %v357_v17 = vmul.f32 %v349_v11, %v325_v10  ;;  %v350_v19 = vadd.f32 1.0, %v493_v12 }
 0x109   :  { %v497_v20 = vpop.eup %496  ;;  %v356_v21 = vmul.f32 %v348_v15, %v324_v14  ;;  %v351_v23 = vadd.f32 1.0, %v495_v16 }
 0x10a   :  { %v499_v24 = vpop.eup %498  ;;  %v358_v25 = vmul.f32 %v350_v19, %v326_v18  ;;  %v353_v27 = vadd.f32 1.0, %v497_v20 }
 0x10b   :  { %v501_v28 = vpop.eup %500  ;;  %v432_v29 = vpack.c.bf16 %v356_v21, %v355_v13  ;;  %v359_v30 = vmul.f32 %v351_v23, %v327_v22  ;;  %v352_v32 = vadd.f32 1.0, %v499_v24 }
 0x10c   :  { %v433_v33 = vpack.c.bf16 %v358_v25, %v357_v17  ;;  %v361_v34 = vmul.f32 %v353_v27, %v329_v26  ;;  %v354_v36 = vadd.f32 1.0, %v501_v28 }
 0x10d   :  { %387 = vst [vmem:[%s640_s3] sm:$0xff] %v432_v29  ;;  %v360_v37 = vmul.f32 %v352_v32, %v328_v31 }
 0x10e   :  { %388 = vst [vmem:[%s640_s3 + $0x8] sm:$0xff] %v433_v33  ;;  %v362_v38 = vmul.f32 %v354_v36, %v330_v35 }
 0x10f   :  { %v434_v39 = vpack.c.bf16 %v360_v37, %v359_v30 }
 0x110   :  { %v435_v40 = vpack.c.bf16 %v362_v38, %v361_v34 }
 0x111   :  { %389 = vst [vmem:[%s640_s3 + $0x10] sm:$0xff] %v434_v39 }
 0x112   :  { %390 = vst [vmem:[%s640_s3 + $0x18] sm:$0xff] %v435_v40 }

// kernel: bert_forward.17
= control target key start
LH: loop header
LB: loop body
LE: loop exit
PB: predicated region body
PF: predicated region fallthrough
CT: control target
= control target key end

     0   :  { %s750_s1 = inlined_call_operand.vmem [shape: bf16[512,128], index: 1, kind: input, shape index: {}]   ;;  %s751_s0 = inlined_call_operand.vmem [shape: bf16[16,512], index: 0, kind: input, shape index: {}]   ;;  %s752_s2 = inlined_call_operand.vmem [shape: f32[1,128], index: 2, kind: input, shape index: {}]   ;;  %s753_s3 = inlined_call_operand.vmem [shape: bf16[16,128], index: 3, kind: input, shape index: {}]   ;;  %s754_s4 = inlined_call_operand.vmem [shape: f32[1,128], index: 4, kind: input, shape index: {}]   ;;  %s755_s5 = inlined_call_operand.vmem [shape: f32[1,128], index: 5, kind: input, shape index: {}]   ;;  %s756_s6 = inlined_call_operand.vmem [shape: bf16[16,128], index: 6, kind: output, shape index: {}]  }
   0x1   :  { %v550_v0 = vld [vmem:[%s750_s1 + $0x40] sm:$0xff]   ;;  %v554_v4 = vld [vmem:[%s750_s1 + $0x48] sm:$0xff]   ;;  %v558_v8 = vld [vmem:[%s750_s1 + $0x50] sm:$0xff]  }
   0x2   :  { %v551_v1 = vld [vmem:[%s750_s1 + $0xc0] sm:$0xff]   ;;  %506 = vmatprep.subr.bf16.mxu0 %v550_v0  ;;  %v555_v5 = vld [vmem:[%s750_s1 + $0xc8] sm:$0xff]   ;;  %v559_v9 = vld [vmem:[%s750_s1 + $0xd0] sm:$0xff]  }
   0x3   :  { %v552_v2 = vld [vmem:[%s750_s1] sm:$0xff]   ;;  %528 = vmatprep.subr.bf16.mxu1 %v551_v1  ;;  %v556_v6 = vld [vmem:[%s750_s1 + $0x8] sm:$0xff]   ;;  %v560_v10 = vld [vmem:[%s750_s1 + $0x10] sm:$0xff]  }
   0x4   :  { %v553_v3 = vld [vmem:[%s750_s1 + $0x80] sm:$0xff]   ;;  %507 = vmatpush3.bf16.msra.mxu0 %v552_v2  ;;  %v557_v7 = vld [vmem:[%s750_s1 + $0x88] sm:$0xff]   ;;  %v561_v11 = vld [vmem:[%s750_s1 + $0x90] sm:$0xff]  }
   0x5   :  { %529 = vmatpush3.bf16.msra.mxu1 %v553_v3  ;;  %508 = vmatprep.subr.bf16.mxu0 %v554_v4  ;;  %v562_v12 = vld [vmem:[%s750_s1 + $0x58] sm:$0xff]   ;;  %v566_v16 = vld [vmem:[%s750_s1 + $0x60] sm:$0xff]   ;;  %v570_v20 = vld [vmem:[%s750_s1 + $0x68] sm:$0xff]  }
   0x6   :  { %530 = vmatprep.subr.bf16.mxu1 %v555_v5  ;;  %v563_v13 = vld [vmem:[%s750_s1 + $0xd8] sm:$0xff]   ;;  %v567_v17 = vld [vmem:[%s750_s1 + $0xe0] sm:$0xff]   ;;  %v571_v21 = vld [vmem:[%s750_s1 + $0xe8] sm:$0xff]  }
   0x7   :  { %v564_v14 = vld [vmem:[%s750_s1 + $0x18] sm:$0xff]   ;;  %v568_v18 = vld [vmem:[%s750_s1 + $0x20] sm:$0xff]   ;;  %v572_v22 = vld [vmem:[%s750_s1 + $0x28] sm:$0xff]  }
   0x8   :  { %509 = vmatpush3.bf16.msra.mxu0 %v556_v6  ;;  %v565_v15 = vld [vmem:[%s750_s1 + $0x98] sm:$0xff]   ;;  %v569_v19 = vld [vmem:[%s750_s1 + $0xa0] sm:$0xff]   ;;  %v573_v23 = vld [vmem:[%s750_s1 + $0xa8] sm:$0xff]  }
   0x9   :  { %531 = vmatpush3.bf16.msra.mxu1 %v557_v7  ;;  %510 = vmatprep.subr.bf16.mxu0 %v558_v8  ;;  %v574_v24 = vld [vmem:[%s750_s1 + $0x70] sm:$0xff]   ;;  %v578_v28 = vld [vmem:[%s750_s1 + $0x78] sm:$0xff]   ;;  %v454_v38 = vld [vmem:[%s752_s2] ss:$0 sm:$0xff] }
   0xa   :  { %532 = vmatprep.subr.bf16.mxu1 %v559_v9  ;;  %v575_v25 = vld [vmem:[%s750_s1 + $0xf0] sm:$0xff]   ;;  %v579_v29 = vld [vmem:[%s750_s1 + $0xf8] sm:$0xff]   ;;  %v498_v40 = vld [vmem:[%s753_s3] sm:$0xff]  }
   0xb   :  { %v576_v26 = vld [vmem:[%s750_s1 + $0x30] sm:$0xff]   ;;  %v580_v30 = vld [vmem:[%s750_s1 + $0x38] sm:$0xff]   ;;  %v499_v50 = vunpack.c.l.bf16 %v498_v40  ;;  %v500_v56 = vunpack.c.h.bf16 %v498_v40 }
   0xc   :  { %511 = vmatpush3.bf16.msra.mxu0 %v560_v10  ;;  %v577_v27 = vld [vmem:[%s750_s1 + $0xb0] sm:$0xff]   ;;  %v581_v31 = vld [vmem:[%s750_s1 + $0xb8] sm:$0xff]   ;;  %v491_v10 = vld [vmem:[%s754_s4] ss:$0 sm:$0xff] }
   0xd   :  { %533 = vmatpush3.bf16.msra.mxu1 %v561_v11  ;;  %512 = vmatprep.subr.bf16.mxu0 %v562_v12  ;;  %v582_v32 = vld [vmem:[%s751_s0] ss:$16 sps:$4 sm:$0xff]   ;;  %v584_v33 = vld [vmem:[%s751_s0 + $0x4] ss:$16 sps:$4 sm:$0xff]   ;;  %v585_v34 = vld [vmem:[%s751_s0 + $0x8] ss:$16 sps:$4 sm:$0xff]  }
   0xe   :  { %534 = vmatprep.subr.bf16.mxu1 %v563_v13  ;;  %v587_v35 = vld [vmem:[%s751_s0 + $0xc] ss:$16 sps:$4 sm:$0xff]   ;;  %343 = vmatprep.mubr.bf16.mxu0 %v584_v33 }
   0xf   :  { %384 = vmatprep.mubr.bf16.mxu1 %v587_v35 }
  0x10   :  { %513 = vmatpush3.bf16.msra.mxu0 %v564_v14  ;;  %v492_v14 = vld [vmem:[%s755_s5] ss:$0 sm:$0xff] }
  0x11   :  { %535 = vmatpush3.bf16.msra.mxu1 %v565_v15  ;;  %514 = vmatprep.subr.bf16.mxu0 %v566_v16 }
  0x12   :  { %536 = vmatprep.subr.bf16.mxu1 %v567_v17 }
  0x14   :  { %515 = vmatpush3.bf16.msra.mxu0 %v568_v18 }
  0x15   :  { %537 = vmatpush3.bf16.msra.mxu1 %v569_v19  ;;  %516 = vmatprep.subr.bf16.mxu0 %v570_v20 }
  0x16   :  { %538 = vmatprep.subr.bf16.mxu1 %v571_v21 }
  0x18   :  { %517 = vmatpush3.bf16.msra.mxu0 %v572_v22 }
  0x19   :  { %539 = vmatpush3.bf16.msra.mxu1 %v573_v23  ;;  %518 = vmatprep.subr.bf16.mxu0 %v574_v24 }
  0x1a   :  { %540 = vmatprep.subr.bf16.mxu1 %v575_v25 }
  0x1c   :  { %519 = vmatpush3.bf16.msra.mxu0 %v576_v26 }
  0x1d   :  { %541 = vmatpush3.bf16.msra.mxu1 %v577_v27  ;;  %520 = vmatprep.subr.bf16.mxu0 %v578_v28 }
  0x1e   :  { %542 = vmatprep.subr.bf16.mxu1 %v579_v29 }
  0x20   :  { %521 = vmatpush3.bf16.msra.mxu0 %v580_v30 }
  0x21   :  { %543 = vmatpush3.bf16.msra.mxu1 %v581_v31 }
  0x23   :  { %344 = vmatmul.mubr.bf16.vlgmr.msra.gmra.mrb[0].mxu0 %v582_v32 }
  0x24   :  { %385 = vmatmul.mubr.bf16.vlgmr.msra.gmra.mrb[0].mxu1 %v585_v34 }
  0xf6   :  { %v522_v36 = vpop.f32.mrb[0].mxu0 }
  0xf7   :  { %v544_v37 = vpop.f32.mrb[0].mxu1  ;;  %v523_v39 = vpop.f32.mrb[1].mxu0 }
  0xf8   :  { %v524_v41 = vadd.f32 %v523_v39, %v522_v36  ;;  %v545_v42 = vpop.f32.mrb[1].mxu1  ;;  %v525_v43 = vpop.f32.mrb[2].mxu0 }
  0xf9   :  { %v546_v44 = vadd.f32 %v545_v42, %v544_v37  ;;  %v547_v45 = vpop.f32.mrb[2].mxu1  ;;  %v526_v46 = vpop.f32.mrb[3].mxu0 }
  0xfa   :  { %v346_v47 = vadd.f32 %v524_v41, %v454_v38  ;;  %v527_v48 = vadd.f32 %v526_v46, %v525_v43  ;;  %v548_v49 = vpop.f32.mrb[3].mxu1 }
  0xfb   :  { %v549_v51 = vadd.f32 %v548_v49, %v547_v45 }
  0xfc   :  { %v387_v52 = vadd.f32 %v546_v44, %v346_v47  ;;  %v349_v53 = vadd.f32 %v527_v48, %v454_v38 }
  0xfe   :  { %v390_v54 = vadd.f32 %v549_v51, %v349_v53  ;;  %v397_v55 = vadd.f32 %v499_v50, %v387_v52 }
 0x100   :  { %399 = vadd.xlane.f32.xlu0 %v397_v55  ;;  %v398_v57 = vadd.f32 %v500_v56, %v390_v54 }
 0x104   :  { %401 = vadd.xlane.f32.xlu0 %v398_v57 }
 0x18d   :  { %v400_v58 = vpop.xlane.xlu0 %399 }
 0x18e   :  { %v404_v59 = vmul.f32 0.0078125, %v400_v58 }
 0x190   :  { %v406_v60 = vsub.f32 %v397_v55, %v404_v59 }
 0x191   :  { %v402_v61 = vpop.xlane.xlu0 %401 }
 0x192   :  { %v405_v62 = vmul.f32 0.0078125, %v402_v61  ;;  %v408_v63 = vmul.f32 %v406_v60, %v406_v60 }
 0x194   :  { %v407_v0 = vsub.f32 %v398_v57, %v405_v62  ;;  %410 = vadd.xlane.f32.xlu1 %v408_v63 }
 0x196   :  { %v409_v1 = vmul.f32 %v407_v0, %v407_v0 }
 0x198   :  { %412 = vadd.xlane.f32.xlu1 %v409_v1 }
 0x221   :  { %v411_v2 = vpop.xlane.xlu1 %410 }
 0x222   :  { %v414_v3 = vmul.f32 0.0078125, %v411_v2 }
 0x224   :  { %v416_v4 = vadd.f32 1e-12, %v414_v3 }
 0x225   :  { %v413_v5 = vpop.xlane.xlu1 %412 }
 0x226   :  { %588 = vrsqrt.f32 %v416_v4  ;;  %v415_v6 = vmul.f32 0.0078125, %v413_v5 }
 0x228   :  { %v417_v7 = vadd.f32 1e-12, %v415_v6 }
 0x22a   :  { %590 = vrsqrt.f32 %v417_v7 }
 0x230   :  { %v589_v8 = vpop.eup %588 }
 0x231   :  { %v420_v9 = vmul.f32 %v589_v8, %v406_v60 }
 0x233   :  { %v429_v12 = vmul.f32 %v491_v10, %v420_v9 }
 0x234   :  { %v591_v11 = vpop.eup %590 }
 0x235   :  { %v421_v13 = vmul.f32 %v591_v11, %v407_v0  ;;  %v438_v16 = vadd.f32 %v492_v14, %v429_v12 }
 0x237   :  { %v430_v15 = vmul.f32 %v491_v10, %v421_v13 }
 0x239   :  { %v439_v17 = vadd.f32 %v492_v14, %v430_v15 }
 0x23b   :  { %v504_v18 = vpack.c.bf16 %v439_v17, %v438_v16 }
 0x23d   :  { %505 = vst [vmem:[%s756_s6] sm:$0xff] %v504_v18  }

// kernel: bert_forward.23
= control target key start
LH: loop header
LB: loop body
LE: loop exit
PB: predicated region body
PF: predicated region fallthrough
CT: control target
= control target key end

     0   :  { %13 = vsyncpa [#allocation3], 0  ;;  %v465_v1 = vmov 0.0   ;;  %vm466_vm0 = vmmov 0   ;;  %s597_s0 = inlined_call_operand.vmem [shape: bf16[2,128], index: 0, kind: input, shape index: {}]   ;;  %s598_s1 = inlined_call_operand.vmem [shape: bf16[128,128], index: 1, kind: input, shape index: {}]   ;;  %s599_s2 = inlined_call_operand.vmem [shape: f32[1,128], index: 2, kind: input, shape index: {}]   ;;  %s600_s3 = inlined_call_operand.vmem [shape: bf16[128,3], index: 3, kind: input, shape index: {}]   ;;  %s601_s4 = inlined_call_operand.vmem [shape: f32[1,3], index: 4, kind: input, shape index: {}]   ;;  %s602_s5 = inlined_call_operand.vmem [shape: f32[2,3], index: 5, kind: input, shape index: {}]   ;;  %s603_s6 = inlined_call_operand.hbm [shape: f32[2,3], index: 6, kind: output, shape index: {0}]   ;;  %s604_s7 = inlined_call_operand.hbm [shape: f32[1,1], index: 7, kind: output, shape index: {1}]  }
   0x1   :  { %v395_v0 = vld [vmem:[%s598_s1] sm:$0xff]   ;;  %349 = vmatprep.subr.bf16.mxu0 %v465_v1  ;;  %369 = vmatprep.subr.bf16.mxu1 %v465_v1  ;;  %v396_v2 = vld [vmem:[%s598_s1 + $0x8] sm:$0xff]   ;;  %v397_v3 = vld [vmem:[%s598_s1 + $0x10] sm:$0xff]  }
   0x2   :  { %350 = vmatpush3.bf16.msra.mxu0 %v395_v0  ;;  %365 = vmatprep.mubr.msk.bf16.mxu0 %vm466_vm0, %v465_v1  ;;  %v403_v4 = vld [vmem:[%s600_s3] sm:$0xff]   ;;  %v398_v5 = vld [vmem:[%s598_s1 + $0x18] sm:$0xff]   ;;  %v404_v6 = vld [vmem:[%s600_s3 + $0x8] sm:$0xff]  }
   0x3   :  { %351 = vmatprep.subr.bf16.mxu0 %v465_v1  ;;  %385 = vmatprep.mubr.msk.bf16.mxu1 %vm466_vm0, %v465_v1  ;;  %v399_v7 = vld [vmem:[%s598_s1 + $0x20] sm:$0xff]   ;;  %v405_v8 = vld [vmem:[%s600_s3 + $0x10] sm:$0xff]  }
   0x4   :  { %370 = vmatpush3.bf16.msra.mxu1 %v403_v4 }
   0x5   :  { %371 = vmatprep.subr.bf16.mxu1 %v465_v1 }
   0x6   :  { %352 = vmatpush3.bf16.msra.mxu0 %v396_v2 }
   0x7   :  { %353 = vmatprep.subr.bf16.mxu0 %v465_v1 }
   0x8   :  { %372 = vmatpush3.bf16.msra.mxu1 %v404_v6 }
   0xa   :  { %354 = vmatpush3.bf16.msra.mxu0 %v397_v3 }
   0xb   :  { %355 = vmatprep.subr.bf16.mxu0 %v465_v1 }
   0xe   :  { %356 = vmatpush3.bf16.msra.mxu0 %v398_v5 }
   0xf   :  { %357 = vmatprep.subr.bf16.mxu0 %v465_v1 }
  0x10   :  { %14 = vsyncpa [#allocation5], 0  ;;  %373 = vmatprep.subr.bf16.mxu1 %v465_v1  ;;  %v400_v9 = vld [vmem:[%s598_s1 + $0x28] sm:$0xff]   ;;  %v406_v10 = vld [vmem:[%s600_s3 + $0x18] sm:$0xff]   ;;  %vm253_vm1 = vcmask 17408  }
  0x11   :  { %374 = vmatpush3.bf16.msra.mxu1 %v405_v8  ;;  %v401_v11 = vld [vmem:[%s598_s1 + $0x30] sm:$0xff]   ;;  %v402_v12 = vld [vmem:[%s598_s1 + $0x38] sm:$0xff]   ;;  %v28_v13 = vld [vmem:[%s597_s0] sm:$0x1] }
  0x12   :  { %358 = vmatpush3.bf16.msra.mxu0 %v399_v7  ;;  %375 = vmatprep.subr.bf16.mxu1 %v465_v1  ;;  %v407_v14 = vld [vmem:[%s600_s3 + $0x20] sm:$0xff]   ;;  %v408_v15 = vld [vmem:[%s600_s3 + $0x28] sm:$0xff]   ;;  %v409_v16 = vld [vmem:[%s600_s3 + $0x30] sm:$0xff]  }
  0x13   :  { %359 = vmatprep.subr.bf16.mxu0 %v465_v1  ;;  %v410_v17 = vld [vmem:[%s600_s3 + $0x38] sm:$0xff]   ;;  %v313_v18 = vld [vmem:[%s599_s2] ss:$0 sm:$0xff] }
  0x14   :  { %v322_v26 = vld [vmem:[%s601_s4] ss:$0 sm:$0xff]  ;;  %s467_s4 = smov [#allocation2]  }
  0x15   :  { %376 = vmatpush3.bf16.msra.mxu1 %v406_v10  ;;  %v267_v42 = vld [vmem:[%s602_s5] sm:$0x3]  ;;  %s291_s14 = sshll.u32 %s467_s4, 4  ;;  %s292_s14 = int_to_ptr.vmem [resolvable:$true] %s291_s14 }
  0x16   :  { %360 = vmatpush3.bf16.msra.mxu0 %v400_v9  ;;  %377 = vmatprep.subr.bf16.mxu1 %v465_v1  ;;  %s417_s15 = scalar_lea.vmem %s292_s14, 32  ;;  %p422_p1 = scmp.lt.s32.totalorder %s292_s14, %s292_s14 }
  0x17   :  { %361 = vmatprep.subr.bf16.mxu0 %v465_v1  ;;  %p418_p0 = scmp.ne.s32.totalorder %s292_s14, %s417_s15  ;;  %p423_p2 = scmp.lt.s32.totalorder %s417_s15, %s417_s15 }
  0x19   :  { %378 = vmatpush3.bf16.msra.mxu1 %v407_v14  ;;  %p424_p3 = por %p423_p2, %p422_p1 }
  0x1a   :  { %362 = vmatpush3.bf16.msra.mxu0 %v401_v11  ;;  %379 = vmatprep.subr.bf16.mxu1 %v465_v1 }
  0x1b   :  { %363 = vmatprep.subr.bf16.mxu0 %v465_v1  ;;  %p425_p4 = pnand %p424_p3, %p418_p0 }
  0x1d   :  { %380 = vmatpush3.bf16.msra.mxu1 %v408_v15 }
  0x1e   :  { %364 = vmatpush3.bf16.msra.mxu0 %v402_v12  ;;  %381 = vmatprep.subr.bf16.mxu1 %v465_v1 }
  0x21   :  { %366 = vmatmul.mubr.bf16.vlgmr.msra.gmra.mrb[0].mxu0 %v28_v13  ;;  %382 = vmatpush3.bf16.msra.mxu1 %v409_v16 }
  0x22   :  { %383 = vmatprep.subr.bf16.mxu1 %v465_v1 }
  0x25   :  { %384 = vmatpush3.bf16.msra.mxu1 %v410_v17 }
  0xf4   :  { %v134_v19 = vpop.f32.mrb[0].mxu0 }
  0xf5   :  { %v135_v20 = vadd.f32 %v313_v18, %v134_v19  ;;  %v367_v21 = vpop.f32.mrb[1].mxu0 }
  0xf6   :  { %v137_v22 = vpop.f32.mrb[2].mxu0 }
  0xf7   :  { %411 = vtanh.f32 %v135_v20  ;;  %v368_v23 = vpop.f32.mrb[3].mxu0 }
 0x101   :  { %v412_v24 = vpop.eup %411 }
 0x102   :  { %v141_v25 = vpack.c.bf16 %v412_v24, %v412_v24 }
 0x104   :  { %386 = vmatmul.mubr.bf16.vlgmr.msra.gmra.mrb[0].mxu1 %v141_v25 }
 0x1d7   :  { %v247_v27 = vpop.f32.mrb[0].mxu1 }
 0x1d8   :  { %v248_v28 = vadd.f32 %v322_v26, %v247_v27  ;;  %v387_v29 = vpop.f32.mrb[1].mxu1 }
 0x1d9   :  { %v250_v30 = vpop.f32.mrb[2].mxu1 }
 0x1da   :  { %v388_v31 = vpop.f32.mrb[3].mxu1  ;;  %v255_v32 = vsel %vm253_vm1, %v248_v28, -inf  ;;  %254 = vst.msk [vmem:[#allocation2] sm:$0x3] %vm253_vm1, %v248_v28 }
 0x1db   :  { %256 = vmax.xlane.f32.xlu0 %v255_v32 }
 0x268   :  { %v257_v33 = vpop.xlane.xlu0 %256 }
 0x269   :  { %v258_v34 = vsub.f32 %v248_v28, %v257_v33 }
 0x26b   :  { %v259_v35 = vmul.f32 1.442695, %v258_v34 }
 0x26d   :  { %413 = vpow2.f32 %v259_v35 }
 0x277   :  { %v414_v36 = vpop.eup %413 }
 0x278   :  { %v261_v37 = vsel %vm253_vm1, %v414_v36, 0.0 }
 0x279   :  { %262 = vadd.xlane.f32.xlu0 %v261_v37 }
 0x306   :  { %v263_v38 = vpop.xlane.xlu0 %262 }
 0x307   :  { %415 = vlog2.f32 %v263_v38 }
 0x311   :  { %v416_v39 = vpop.eup %415 }
 0x312   :  { %v265_v40 = vmul.f32 0.6931472, %v416_v39 }
 0x314   :  { %v266_v41 = vadd.f32 %v265_v40, %v257_v33 }
 0x316   :  { %v268_v43 = vsub.f32 %v266_v41, %v248_v28 }
 0x318   :  { %v269_v44 = vmul.f32 %v268_v43, %v267_v42 }
 0x31a   :  { %v270_v45 = vsel %vm253_vm1, %v269_v44, 0.0 }
 0x31b   :  { %271 = vadd.xlane.f32.xlu1 %v270_v45 }
 0x31c   :  { %428 = shalt.err (!%p425_p4)
}
 0x31d   :  { %s429_s18 = scalar_lea.hbm %s603_s6, 32 }
 0x31e   :  { %p430_p5 = scmp.ne.s32.totalorder %s603_s6, %s429_s18  ;;  %p433_p6 = scmp.lt.u32.totalorder %s429_s18, %s603_s6 }
 0x320   :  { %p435_p7 = pnand %p433_p6, %p430_p5 }
 0x322   :  { %438 = shalt.err (!%p435_p7)
}
 0x323   :  { %294 = dma.vmem_to_hbm [thread:$0]  %s292_s14, 32, %s603_s6, [#allocation3]   ;;  %vm283_vm2 = vcmask 0  }
 0x324   :  { %s468_s24 = smov [#allocation4]  }
 0x325   :  { %s301_s25 = sshll.u32 %s468_s24, 4  ;;  %s302_s25 = int_to_ptr.vmem [resolvable:$true] %s301_s25 }
 0x326   :  { %s439_s27 = scalar_lea.vmem %s302_s25, 16  ;;  %s443_s28 = scalar_lea.vmem %s302_s25, 32 }
 0x327   :  { %p440_p8 = scmp.ne.s32.totalorder %s302_s25, %s439_s27  ;;  %p444_p9 = scmp.lt.s32.totalorder %s302_s25, %s302_s25 }
 0x328   :  { %p445_p10 = scmp.lt.s32.totalorder %s443_s28, %s439_s27 }
 0x32a   :  { %p446_p11 = por %p445_p10, %p444_p9 }
 0x32c   :  { %p447_p12 = pnand %p446_p11, %p440_p8 }
 0x3a8   :  { %v272_v46 = vpop.xlane.xlu1 %271 }
 0x3a9   :  { %v273_v47 = vrot.slane %v272_v46, 4 }
 0x3ab   :  { %v274_v48 = vadd.f32 %v273_v47, %v272_v46 }
 0x3ad   :  { %v275_v49 = vrot.slane %v274_v48, 2 }
 0x3af   :  { %v276_v50 = vadd.f32 %v275_v49, %v274_v48 }
 0x3b1   :  { %v277_v51 = vrot.slane %v276_v50, 1 }
 0x3b3   :  { %v278_v52 = vadd.f32 %v277_v51, %v276_v50 }
 0x3b5   :  { %389 = vpush %v278_v52 }
 0x3e6   :  { %s390_s26 = spop %389 }
 0x3e7   :  { %v280_v53 = vstv %s390_s26 }
 0x3e8   :  { %v282_v54 = vmul.f32 0.5, %v280_v53 }
 0x3ea   :  { %284 = vst.msk [vmem:[#allocation4] sm:$0x1] %vm283_vm2, %v282_v54 }
 0x3eb   :  { %450 = shalt.err (!%p447_p12)
}
 0x3ec   :  { %s451_s30 = scalar_lea.hbm %s604_s7, 16 }
 0x3ed   :  { %p452_p13 = scmp.ne.s32.totalorder %s604_s7, %s451_s30  ;;  %p455_p0 = scmp.lt.u32.totalorder %s451_s30, %s604_s7 }
 0x3ef   :  { %p457_p1 = pnand %p455_p0, %p452_p13 }
 0x3f1   :  { %460 = shalt.err (!%p457_p1)
}
 0x3f2   :  { %304 = dma.vmem_to_hbm [thread:$0]  %s302_s25, 16, %s604_s7, [#allocation5]  }
 0x3f3   :  { %461 = dma.done.wait [#allocation3], 32  }
 0x3f4   :  { %462 = vsyncadd [#allocation3], 4294967264 }
 0x3f5   :  { %463 = dma.done.wait [#allocation5], 16  }
 0x3f6   :  { %464 = vsyncadd [#allocation5], 4294967280 }
 0x3f7   :  { %311 = vsyncpa [#allocation3], 1 }
 0x3f8   :  { %312 = vsyncpa [#allocation5], 1 }

</bundles_post_ra>
